<compile_context>
chip_gen: v7x
topology: tpu7x:2x2x1
jax: 0.10.0
libtpu: 0.0.40
codegen_flags: <defaults>
</compile_context>

<pallas_src>
import math
import functools

import jax
import jax.numpy as jnp
from jax.experimental import pallas as pl
from jax.experimental.pallas import tpu as pltpu


def _round_up(a, m):
    return ((a + m - 1) // m) * m


def _choose_tiles(n):
    """Return (TM, TK, N_pad) such that TM | N_pad and TK | N_pad."""
    if n <= 128:
        return 128, 128, 128
    if n <= 1024:
        return 256, 256, _round_up(n, 256)
    if n <= 4096:
        return 512, 512, _round_up(n, 512)
    # Large graphs: big tiles amortize per-grid-step overhead and cut the
    # support re-read factor.  adj tile = 512x2048 bf16 = 2 MiB per buffer.
    return 512, 2048, _round_up(n, 2048)


_VMEM_LIMIT = 48 * 1024 * 1024               # <= v7x 64 MiB physical VMEM per TC
_SUPPORT_RESIDENT_BYTES = 16 * 1024 * 1024   # resident-support budget (incl. 2x buffer)


# --------------------------------------------------------------------------
# Kernel 1: row-tiled dense matmul  support = x @ W  (bf16 output for the
# aggregation's bf16 MXU path; K dim is small so this kernel is minor).
# --------------------------------------------------------------------------
def xw_kernel(x_ref, w_ref, o_ref):
    o_ref[...] = jnp.dot(
        x_ref[...], w_ref[...], preferred_element_type=jnp.float32
    ).astype(o_ref.dtype)


def matmul_rows(x, w, tm, out_dtype=jnp.bfloat16):
    n_pad, f = x.shape
    h = w.shape[1]
    return pl.pallas_call(
        xw_kernel,
        out_shape=jax.ShapeDtypeStruct((n_pad, h), out_dtype),
        grid_spec=pltpu.PrefetchScalarGridSpec(
            num_scalar_prefetch=0,
            grid=(n_pad // tm,),
            in_specs=[
                pl.BlockSpec((tm, f), lambda i: (i, 0)),
                pl.BlockSpec((f, h), lambda i: (0, 0)),
            ],
            out_specs=pl.BlockSpec((tm, h), lambda i: (i, 0)),
        ),
        compiler_params=pltpu.CompilerParams(
            dimension_semantics=("parallel",),
            vmem_limit_bytes=_VMEM_LIMIT,
        ),
    )(x, w)


# --------------------------------------------------------------------------
# Kernel 2: tiled aggregation with fused second-layer transform:
#   x1 = relu(adj @ support + b1)  ;  s2 = x1 @ W2   (written in bf16)
# Block-sparse: empty adj blocks are skipped (no DMA, no dot).
# --------------------------------------------------------------------------
def agg_relu_xw_kernel(occ_ref, fk_ref, adj_ref, s_ref, b_ref, w2_ref,
                       o_ref, acc_ref, *, tk, resident):
    i = pl.program_id(0)
    k = pl.program_id(1)

    @pl.when(k == 0)
    def _():
        acc_ref[...] = jnp.zeros_like(acc_ref)

    @pl.when(occ_ref[i, k] > 0)
    def _():
        if resident:
            start = pl.multiple_of(k * tk, tk)
            s_blk = s_ref[pl.ds(start, tk), :]
        else:
            s_blk = s_ref[...]
        # bf16 x bf16 -> f32 accumulation: native MXU path, adj 0/1 is exact.
        acc_ref[...] += jnp.dot(adj_ref[...], s_blk,
                                preferred_element_type=jnp.float32)

    @pl.when(k == pl.num_programs(1) - 1)
    def _():
        x1 = jnp.maximum(acc_ref[...] + b_ref[...], 0.0)
        # Fused x1 @ W2 (W2 resident, 64 KiB); hidden under the next adj DMA.
        o_ref[...] = jnp.dot(x1, w2_ref[...],
                             preferred_element_type=jnp.float32).astype(o_ref.dtype)


# --------------------------------------------------------------------------
# Kernel 3: second aggregation with fused classifier epilogue:
#   x2 = relu(adj @ support + b2)
#   logits = x2 @ Wlin^T + blin   (padded class lanes masked to -inf)
#   out = log_softmax(logits, axis=1)
# --------------------------------------------------------------------------
def agg_relu_lin_lsm_kernel(occ_ref, fk_ref, adj_ref, s_ref, b_ref, wlt_ref,
                            bl_ref, o_ref, acc_ref, *, tk, resident, nclass):
    i = pl.program_id(0)
    k = pl.program_id(1)

    @pl.when(k == 0)
    def _():
        acc_ref[...] = jnp.zeros_like(acc_ref)

    @pl.when(occ_ref[i, k] > 0)
    def _():
        if resident:
            start = pl.multiple_of(k * tk, tk)
            s_blk = s_ref[pl.ds(start, tk), :]
        else:
            s_blk = s_ref[...]
        acc_ref[...] += jnp.dot(adj_ref[...], s_blk,
                                preferred_element_type=jnp.float32)

    @pl.when(k == pl.num_programs(1) - 1)
    def _():
        x2 = jnp.maximum(acc_ref[...] + b_ref[...], 0.0)
        logits = jnp.dot(x2, wlt_ref[...],
                         preferred_element_type=jnp.float32) + bl_ref[...]
        # Mask padded class lanes so the softmax normalizer only sees real
        # classes; reduction stays full 128-lane wide (lane-dense).
        cls = jax.lax.broadcasted_iota(jnp.int32, logits.shape, 1)
        logits = jnp.where(cls < nclass, logits, -jnp.inf)
        m = jnp.max(logits, axis=1, keepdims=True)
        z = logits - m
        lse = jnp.log(jnp.sum(jnp.exp(z), axis=1, keepdims=True))
        o_ref[...] = (z - lse).astype(o_ref.dtype)


# --------------------------------------------------------------------------
# Shared pallas_call wrapper for the two aggregation kernels.
# --------------------------------------------------------------------------
def _agg_call(kernel, adj, occ, fk, support, extra_ops, extra_specs,
              out_shape, tm, tk, resident):
    n_pad = adj.shape[0]
    h = support.shape[1]
    c_out = out_shape.shape[1]

    # adj: re-point empty blocks at the previously fetched block -> no new DMA.
    adj_spec = pl.BlockSpec((tm, tk), lambda i, k, occ_r, fk_r: (i, fk_r[i, k]))
    if resident:
        # Whole support resident in VMEM; DMA'd once per layer.
        s_spec = pl.BlockSpec((n_pad, h), lambda i, k, occ_r, fk_r: (0, 0))
    else:
        s_spec = pl.BlockSpec((tk, h), lambda i, k, occ_r, fk_r: (fk_r[i, k], 0))

    return pl.pallas_call(
        kernel,
        out_shape=out_shape,
        grid_spec=pltpu.PrefetchScalarGridSpec(
            num_scalar_prefetch=2,
            grid=(n_pad // tm, n_pad // tk),
            in_specs=[adj_spec, s_spec] + extra_specs,
            out_specs=pl.BlockSpec((tm, c_out), lambda i, k, occ_r, fk_r: (i, 0)),
            scratch_shapes=[pltpu.VMEM((tm, h), jnp.float32)],
        ),
        compiler_params=pltpu.CompilerParams(
            dimension_semantics=("parallel", "arbitrary"),
            vmem_limit_bytes=_VMEM_LIMIT,
        ),
    )(occ, fk, adj, support, *extra_ops)


# --------------------------------------------------------------------------
# Graph preprocessing: built ONCE per graph, reused across forwards.
#   adj : dense padded bf16 0/1 adjacency (lossless, half the HBM traffic)
#   occ : per-(row-tile, col-tile) occupancy (int32) -> block-skip the dot
#   fk  : "fetch index" table -> empty blocks re-point the adj DMA at the
#         previously fetched block so no new DMA is issued
# --------------------------------------------------------------------------
def preprocess_graph(edge_index, n):
    tm, tk, n_pad = _choose_tiles(n)
    src = edge_index[0].astype(jnp.int32)
    dst = edge_index[1].astype(jnp.int32)

    adj = (
        jnp.zeros((n_pad, n_pad), jnp.bfloat16)
        .at[src, dst]
        .set(1.0)
    )

    nbr, nbk = n_pad // tm, n_pad // tk
    occ = jnp.zeros((nbr, nbk), jnp.int32).at[src // tm, dst // tk].set(1)
    ks = jax.lax.broadcasted_iota(jnp.int32, (nbr, nbk), 1)
    fk = jnp.maximum(jax.lax.cummax(jnp.where(occ > 0, ks, -1), axis=1), 0)
    return adj, occ, fk.astype(jnp.int32)


# --------------------------------------------------------------------------
# Parameter init (matches PyTorch reset_parameters / nn.Linear defaults)
# --------------------------------------------------------------------------
def init_params(key, nfeat, nhid, nclass):
    ks = jax.random.split(key, 6)
    params = {}
    stdv1 = 1.0 / math.sqrt(nhid)
    params["gc1_w"] = jax.random.uniform(ks[0], (nfeat, nhid), jnp.float32, -stdv1, stdv1)
    params["gc1_b"] = jax.random.uniform(ks[1], (nhid,), jnp.float32, -stdv1, stdv1)
    stdv2 = 1.0 / math.sqrt(nhid)
    params["gc2_w"] = jax.random.uniform(ks[2], (nhid, nhid), jnp.float32, -stdv2, stdv2)
    params["gc2_b"] = jax.random.uniform(ks[3], (nhid,), jnp.float32, -stdv2, stdv2)
    stdv3 = 1.0 / math.sqrt(nhid)
    params["lin_w"] = jax.random.uniform(ks[4], (nclass, nhid), jnp.float32, -stdv3, stdv3)
    params["lin_b"] = jax.random.uniform(ks[5], (nclass,), jnp.float32, -stdv3, stdv3)
    return params


# --------------------------------------------------------------------------
# Model forward: takes the preprocessed graph (adj / occ / fk) so the dense
# adjacency is NOT rebuilt on every call.  Three pallas_calls total:
#   1) s1 = x @ W1
#   2) s2 = relu(adj @ s1 + b1) @ W2          (fused epilogue)
#   3) out = log_softmax(relu(adj @ s2 + b2) @ Wlin^T + blin)   (fused)
# --------------------------------------------------------------------------
@jax.jit
def gcn2layer_sparse_forward(params, x, adj, occ, fk):
    n, nfeat = x.shape
    n_pad = adj.shape[0]
    nbr, nbk = occ.shape
    tm, tk = n_pad // nbr, n_pad // nbk

    nhid = params["gc1_w"].shape[1]
    nclass = params["lin_w"].shape[0]

    f_pad = _round_up(nfeat, 128)
    h_pad = _round_up(nhid, 128)
    c_pad = _round_up(nclass, 128)

    # Resident support if it fits the budget (incl. pipeline double buffer).
    resident = (n_pad * h_pad * 2 * 2) <= _SUPPORT_RESIDENT_BYTES

    # Lane-dense padding of the node features (zero cols are exact).
    x_pad = jnp.zeros((n_pad, f_pad), jnp.float32).at[:n, :nfeat].set(
        x.astype(jnp.float32))

    w1 = jnp.pad(params["gc1_w"], ((0, f_pad - nfeat), (0, h_pad - nhid)))
    b1 = jnp.pad(params["gc1_b"], (0, h_pad - nhid)).reshape(1, h_pad)
    w2 = jnp.pad(params["gc2_w"], ((0, h_pad - nhid), (0, h_pad - nhid)))
    b2 = jnp.pad(params["gc2_b"], (0, h_pad - nhid)).reshape(1, h_pad)
    wlt = jnp.pad(params["lin_w"].T, ((0, h_pad - nhid), (0, c_pad - nclass)))
    bl = jnp.pad(params["lin_b"], (0, c_pad - nclass)).reshape(1, c_pad)

    # 1) support of layer 1 (stored bf16 in HBM).
    s1 = matmul_rows(x_pad, w1, tm)

    # 2) x1 = relu(adj @ s1 + b1); dropout (eval) = identity; s2 = x1 @ W2.
    kernel2 = functools.partial(agg_relu_xw_kernel, tk=tk, resident=resident)
    s2 = _agg_call(
        kernel2, adj, occ, fk, s1,
        extra_ops=[b1, w2],
        extra_specs=[
            pl.BlockSpec((1, h_pad), lambda i, k, o, f: (0, 0)),
            pl.BlockSpec((h_pad, h_pad), lambda i, k, o, f: (0, 0)),
        ],
        out_shape=jax.ShapeDtypeStruct((n_pad, h_pad), jnp.bfloat16),
        tm=tm, tk=tk, resident=resident)

    # 3) x2 = relu(adj @ s2 + b2); dropout (eval) = identity; classifier +
    #    log_softmax fused in the epilogue.
    kernel3 = functools.partial(agg_relu_lin_lsm_kernel, tk=tk,
                                resident=resident, nclass=nclass)
    out_pad = _agg_call(
        kernel3, adj, occ, fk, s2,
        extra_ops=[b2, wlt, bl],
        extra_specs=[
            pl.BlockSpec((1, h_pad), lambda i, k, o, f: (0, 0)),
            pl.BlockSpec((h_pad, c_pad), lambda i, k, o, f: (0, 0)),
            pl.BlockSpec((1, c_pad), lambda i, k, o, f: (0, 0)),
        ],
        out_shape=jax.ShapeDtypeStruct((n_pad, c_pad), jnp.float32),
        tm=tm, tk=tk, resident=resident)

    return out_pad[:n, :nclass]


# --------------------------------------------------------------------------
# Pure-JAX references for verification.
#   match_kernel_dtypes=True applies the same bf16 rounding points as the
#   kernel (support streams), so the tight tolerance is meaningful.
# --------------------------------------------------------------------------
def reference_forward(params, x, edge_index, match_kernel_dtypes=False):
    n = x.shape[0]
    adj = jnp.zeros((n, n), jnp.float32).at[edge_index[0], edge_index[1]].set(1.0)

    def rnd(a):
        if match_kernel_dtypes:
            return a.astype(jnp.bfloat16).astype(jnp.float32)
        return a

    s1 = rnd(x @ params["gc1_w"])
    x1 = jax.nn.relu(adj @ s1 + params["gc1_b"])
    s2 = rnd(x1 @ params["gc2_w"])
    x2 = jax.nn.relu(adj @ s2 + params["gc2_b"])
    y = x2 @ params["lin_w"].T + params["lin_b"]
    return jax.nn.log_softmax(y, axis=1)


if __name__ == "__main__":
    key = jax.random.PRNGKey(0)
    k_param, k_x, k_e = jax.random.split(key, 3)

    N = 8       # number of graph nodes
    NFEAT = 16
    NHID = 32
    NCLASS = 4
    N_EDGES = 20

    params = init_params(k_param, NFEAT, NHID, NCLASS)
    x = jax.random.normal(k_x, (N, NFEAT), jnp.float32)
    edge_index = jax.random.randint(k_e, (2, N_EDGES), 0, N, jnp.int32)

    # Graph preprocessing happens once and is reused across forward passes.
    adj, occ, fk = preprocess_graph(edge_index, N)

    out = gcn2layer_sparse_forward(params, x, adj, occ, fk)
    out = jax.block_until_ready(out)
    assert out.shape == (N, NCLASS)

    # Tight check against a reference that applies the same bf16 rounding
    # points as the kernel; loose sanity check against the pure-f32 reference.
    ref_matched = reference_forward(params, x, edge_index, match_kernel_dtypes=True)
    ref_f32 = reference_forward(params, x, edge_index, match_kernel_dtypes=False)
    assert jnp.allclose(out, ref_matched, atol=2e-2, rtol=2e-2), \
        "mismatch vs bf16-matched reference"
    assert jnp.allclose(out, ref_f32, atol=2.5e-1, rtol=2.5e-1), \
        "mismatch vs f32 reference"

    print("KERNEL_OK")
</pallas_src>

<mosaic_0001>
module attributes {stable_mosaic.version = 11 : i64} {
  func.func @xw_kernel(%arg0: i32, %arg1: memref<128x128xf32, #tpu.memory_space<vmem>>, %arg2: memref<128x128xf32, #tpu.memory_space<vmem>>, %arg3: memref<128x128xbf16, #tpu.memory_space<vmem>>) attributes {dimension_semantics = [#tpu.dimension_semantics<parallel>], iteration_bounds = array<i64: 1>, scalar_prefetch = 0 : i64, scratch_operands = 0 : i64, tpu.core_type = #tpu.core_type<tc>, window_params = [{transform_indices = @transform_0, window_bounds = array<i64: 128, 128>}, {pipeline_mode = #tpu.pipeline_mode<synchronous>, transform_indices = @transform_1, window_bounds = array<i64: 128, 128>}, {transform_indices = @transform_2, window_bounds = array<i64: 128, 128>}]} {
    %c0 = arith.constant 0 : index
    %c0_0 = arith.constant 0 : index
    %0 = vector.load %arg1[%c0, %c0_0] : memref<128x128xf32, #tpu.memory_space<vmem>>, vector<128x128xf32>
    %c0_1 = arith.constant 0 : index
    %c0_2 = arith.constant 0 : index
    %1 = vector.load %arg2[%c0_1, %c0_2] : memref<128x128xf32, #tpu.memory_space<vmem>>, vector<128x128xf32>
    %cst = arith.constant dense<0.000000e+00> : vector<128x128xf32>
    %2 = tpu.matmul %0, %1, %cst {dimension_numbers = #tpu.dot_dimension_numbers<[1], [0], [0], [1], [0, 0, 1, 1], [], []>} : vector<128x128xf32>, vector<128x128xf32>, vector<128x128xf32> -> vector<128x128xf32>
    %3 = arith.truncf %2 : vector<128x128xf32> to vector<128x128xbf16>
    %c0_3 = arith.constant 0 : index
    %c0_4 = arith.constant 0 : index
    %4 = vector.load %arg3[%c0_3, %c0_4] : memref<128x128xbf16, #tpu.memory_space<vmem>>, vector<128x128xbf16>
    tpu.vector_store %arg3[%c0_3, %c0_4], %3 {strides = array<i32>} : memref<128x128xbf16, #tpu.memory_space<vmem>>, vector<128x128xbf16>,
    return
  }
  func.func @transform_0(%arg0: i32) -> (i32, i32) {
    %c0_i32 = arith.constant 0 : i32
    %c0_i32_0 = arith.constant 0 : i32
    return %arg0, %c0_i32 : i32, i32
  }
  func.func @transform_1(%arg0: i32) -> (i32, i32) {
    %c0_i32 = arith.constant 0 : i32
    %c0_i32_0 = arith.constant 0 : i32
    %c0_i32_1 = arith.constant 0 : i32
    return %c0_i32, %c0_i32_0 : i32, i32
  }
  func.func @transform_2(%arg0: i32) -> (i32, i32) {
    %c0_i32 = arith.constant 0 : i32
    %c0_i32_0 = arith.constant 0 : i32
    return %arg0, %c0_i32 : i32, i32
  }
}

module attributes {stable_mosaic.version = 11 : i64} {
  func.func @agg_relu_xw_kernel(%arg0: i32, %arg1: i32, %arg2: memref<1x1xi32, #tpu.memory_space<smem>>, %arg3: memref<1x1xi32, #tpu.memory_space<smem>>, %arg4: memref<128x128xbf16, #tpu.memory_space<vmem>>, %arg5: memref<128x128xbf16, #tpu.memory_space<vmem>>, %arg6: memref<1x128xf32, #tpu.memory_space<vmem>>, %arg7: memref<128x128xf32, #tpu.memory_space<vmem>>, %arg8: memref<128x128xbf16, #tpu.memory_space<vmem>>, %arg9: memref<128x128xf32, #tpu.memory_space<vmem>>) attributes {dimension_semantics = [#tpu.dimension_semantics<parallel>, #tpu.dimension_semantics<arbitrary>], iteration_bounds = array<i64: 1, 1>, scalar_prefetch = 2 : i64, scratch_operands = 1 : i64, tpu.core_type = #tpu.core_type<tc>, window_params = [{transform_indices = @transform_0, window_bounds = array<i64: 128, 128>}, {pipeline_mode = #tpu.pipeline_mode<synchronous>, transform_indices = @transform_1, window_bounds = array<i64: 128, 128>}, {pipeline_mode = #tpu.pipeline_mode<synchronous>, transform_indices = @transform_2, window_bounds = array<i64: 1, 128>}, {pipeline_mode = #tpu.pipeline_mode<synchronous>, transform_indices = @transform_3, window_bounds = array<i64: 128, 128>}, {transform_indices = @transform_4, window_bounds = array<i64: 128, 128>}]} {
    %c0_i32 = arith.constant 0 : i32
    %0 = arith.cmpi eq, %arg1, %c0_i32 : i32
    %1 = arith.extui %0 : i1 to i32
    %c0_i32_0 = arith.constant 0 : i32
    %2 = arith.cmpi ne, %1, %c0_i32_0 : i32
    scf.if %2 {
      %cst = arith.constant 0.000000e+00 : f32
      %12 = vector.broadcast %cst : f32 to vector<128x128xf32>
      %c0 = arith.constant 0 : index
      %c0_5 = arith.constant 0 : index
      %13 = vector.load %arg9[%c0, %c0_5] : memref<128x128xf32, #tpu.memory_space<vmem>>, vector<128x128xf32>
      tpu.vector_store %arg9[%c0, %c0_5], %12 {strides = array<i32>} : memref<128x128xf32, #tpu.memory_space<vmem>>, vector<128x128xf32>,
    } else {
    }
    %3 = arith.index_cast %arg0 : i32 to index
    %4 = arith.index_cast %arg1 : i32 to index
    %5 = memref.load %arg2[%3, %4] : memref<1x1xi32, #tpu.memory_space<smem>>
    %c0_i32_1 = arith.constant 0 : i32
    %6 = arith.cmpi sgt, %5, %c0_i32_1 : i32
    %7 = arith.extui %6 : i1 to i32
    %c0_i32_2 = arith.constant 0 : i32
    %8 = arith.cmpi ne, %7, %c0_i32_2 : i32
    scf.if %8 {
      %c128_i32 = arith.constant 128 : i32
      %12 = arith.muli %arg1, %c128_i32 : i32
      %13 = tpu.assume_multiple %12, 128 : i32
      %14 = arith.index_cast %13 : i32 to index
      %c0 = arith.constant 0 : index
      %15 = vector.load %arg5[%14, %c0] : memref<128x128xbf16, #tpu.memory_space<vmem>>, vector<128x128xbf16>
      %c0_5 = arith.constant 0 : index
      %c0_6 = arith.constant 0 : index
      %16 = vector.load %arg9[%c0_5, %c0_6] : memref<128x128xf32, #tpu.memory_space<vmem>>, vector<128x128xf32>
      %c0_7 = arith.constant 0 : index
      %c0_8 = arith.constant 0 : index
      %17 = vector.load %arg4[%c0_7, %c0_8] : memref<128x128xbf16, #tpu.memory_space<vmem>>, vector<128x128xbf16>
      %cst = arith.constant dense<0.000000e+00> : vector<128x128xf32>
      %18 = tpu.matmul %17, %15, %cst {dimension_numbers = #tpu.dot_dimension_numbers<[1], [0], [0], [1], [0, 0, 1, 1], [], []>} : vector<128x128xbf16>, vector<128x128xbf16>, vector<128x128xf32> -> vector<128x128xf32>
      %19 = arith.addf %16, %18 : vector<128x128xf32>
      %c0_9 = arith.constant 0 : index
      %c0_10 = arith.constant 0 : index
      %20 = vector.load %arg9[%c0_9, %c0_10] : memref<128x128xf32, #tpu.memory_space<vmem>>, vector<128x128xf32>
      tpu.vector_store %arg9[%c0_9, %c0_10], %19 {strides = array<i32>} : memref<128x128xf32, #tpu.memory_space<vmem>>, vector<128x128xf32>,
    } else {
    }
    %c0_i32_3 = arith.constant 0 : i32
    %9 = arith.cmpi eq, %arg1, %c0_i32_3 : i32
    %10 = arith.extui %9 : i1 to i32
    %c0_i32_4 = arith.constant 0 : i32
    %11 = arith.cmpi ne, %10, %c0_i32_4 : i32
    scf.if %11 {
      %c0 = arith.constant 0 : index
      %c0_5 = arith.constant 0 : index
      %12 = vector.load %arg9[%c0, %c0_5] : memref<128x128xf32, #tpu.memory_space<vmem>>, vector<128x128xf32>
      %c0_6 = arith.constant 0 : index
      %c0_7 = arith.constant 0 : index
      %13 = vector.load %arg6[%c0_6, %c0_7] : memref<1x128xf32, #tpu.memory_space<vmem>>, vector<1x128xf32>
      %14 = vector.broadcast %13 : vector<1x128xf32> to vector<128x128xf32>
      %15 = arith.addf %12, %14 : vector<128x128xf32>
      %cst = arith.constant 0.000000e+00 : f32
      %16 = vector.broadcast %cst : f32 to vector<128x128xf32>
      %17 = arith.maximumf %15, %16 : vector<128x128xf32>
      %c0_8 = arith.constant 0 : index
      %c0_9 = arith.constant 0 : index
      %18 = vector.load %arg7[%c0_8, %c0_9] : memref<128x128xf32, #tpu.memory_space<vmem>>, vector<128x128xf32>
      %cst_10 = arith.constant dense<0.000000e+00> : vector<128x128xf32>
      %19 = tpu.matmul %17, %18, %cst_10 {dimension_numbers = #tpu.dot_dimension_numbers<[1], [0], [0], [1], [0, 0, 1, 1], [], []>} : vector<128x128xf32>, vector<128x128xf32>, vector<128x128xf32> -> vector<128x128xf32>
      %20 = arith.truncf %19 : vector<128x128xf32> to vector<128x128xbf16>
      %c0_11 = arith.constant 0 : index
      %c0_12 = arith.constant 0 : index
      %21 = vector.load %arg8[%c0_11, %c0_12] : memref<128x128xbf16, #tpu.memory_space<vmem>>, vector<128x128xbf16>
      tpu.vector_store %arg8[%c0_11, %c0_12], %20 {strides = array<i32>} : memref<128x128xbf16, #tpu.memory_space<vmem>>, vector<128x128xbf16>,
    } else {
    }
    return
  }
  func.func @transform_0(%arg0: i32, %arg1: i32, %arg2: memref<1x1xi32, #tpu.memory_space<smem>>, %arg3: memref<1x1xi32, #tpu.memory_space<smem>>) -> (i32, i32) {
    %0 = arith.index_cast %arg0 : i32 to index
    %1 = arith.index_cast %arg1 : i32 to index
    %2 = memref.load %arg3[%0, %1] : memref<1x1xi32, #tpu.memory_space<smem>>
    %c0_i32 = arith.constant 0 : i32
    return %arg0, %2 : i32, i32
  }
  func.func @transform_1(%arg0: i32, %arg1: i32, %arg2: memref<1x1xi32, #tpu.memory_space<smem>>, %arg3: memref<1x1xi32, #tpu.memory_space<smem>>) -> (i32, i32) {
    %c0_i32 = arith.constant 0 : i32
    %c0_i32_0 = arith.constant 0 : i32
    %c0_i32_1 = arith.constant 0 : i32
    return %c0_i32, %c0_i32_0 : i32, i32
  }
  func.func @transform_2(%arg0: i32, %arg1: i32, %arg2: memref<1x1xi32, #tpu.memory_space<smem>>, %arg3: memref<1x1xi32, #tpu.memory_space<smem>>) -> (i32, i32) {
    %c0_i32 = arith.constant 0 : i32
    %c0_i32_0 = arith.constant 0 : i32
    %c0_i32_1 = arith.constant 0 : i32
    return %c0_i32, %c0_i32_0 : i32, i32
  }
  func.func @transform_3(%arg0: i32, %arg1: i32, %arg2: memref<1x1xi32, #tpu.memory_space<smem>>, %arg3: memref<1x1xi32, #tpu.memory_space<smem>>) -> (i32, i32) {
    %c0_i32 = arith.constant 0 : i32
    %c0_i32_0 = arith.constant 0 : i32
    %c0_i32_1 = arith.constant 0 : i32
    return %c0_i32, %c0_i32_0 : i32, i32
  }
  func.func @transform_4(%arg0: i32, %arg1: i32, %arg2: memref<1x1xi32, #tpu.memory_space<smem>>, %arg3: memref<1x1xi32, #tpu.memory_space<smem>>) -> (i32, i32) {
    %c0_i32 = arith.constant 0 : i32
    %c0_i32_0 = arith.constant 0 : i32
    return %arg0, %c0_i32 : i32, i32
  }
}

module attributes {stable_mosaic.version = 11 : i64} {
  func.func @agg_relu_lin_lsm_kernel(%arg0: i32, %arg1: i32, %arg2: memref<1x1xi32, #tpu.memory_space<smem>>, %arg3: memref<1x1xi32, #tpu.memory_space<smem>>, %arg4: memref<128x128xbf16, #tpu.memory_space<vmem>>, %arg5: memref<128x128xbf16, #tpu.memory_space<vmem>>, %arg6: memref<1x128xf32, #tpu.memory_space<vmem>>, %arg7: memref<128x128xf32, #tpu.memory_space<vmem>>, %arg8: memref<1x128xf32, #tpu.memory_space<vmem>>, %arg9: memref<128x128xf32, #tpu.memory_space<vmem>>, %arg10: memref<128x128xf32, #tpu.memory_space<vmem>>) attributes {dimension_semantics = [#tpu.dimension_semantics<parallel>, #tpu.dimension_semantics<arbitrary>], iteration_bounds = array<i64: 1, 1>, scalar_prefetch = 2 : i64, scratch_operands = 1 : i64, tpu.core_type = #tpu.core_type<tc>, window_params = [{transform_indices = @transform_0, window_bounds = array<i64: 128, 128>}, {pipeline_mode = #tpu.pipeline_mode<synchronous>, transform_indices = @transform_1, window_bounds = array<i64: 128, 128>}, {pipeline_mode = #tpu.pipeline_mode<synchronous>, transform_indices = @transform_2, window_bounds = array<i64: 1, 128>}, {pipeline_mode = #tpu.pipeline_mode<synchronous>, transform_indices = @transform_3, window_bounds = array<i64: 128, 128>}, {pipeline_mode = #tpu.pipeline_mode<synchronous>, transform_indices = @transform_4, window_bounds = array<i64: 1, 128>}, {transform_indices = @transform_5, window_bounds = array<i64: 128, 128>}]} {
    %c0_i32 = arith.constant 0 : i32
    %0 = arith.cmpi eq, %arg1, %c0_i32 : i32
    %1 = arith.extui %0 : i1 to i32
    %c0_i32_0 = arith.constant 0 : i32
    %2 = arith.cmpi ne, %1, %c0_i32_0 : i32
    scf.if %2 {
      %cst = arith.constant 0.000000e+00 : f32
      %12 = vector.broadcast %cst : f32 to vector<128x128xf32>
      %c0 = arith.constant 0 : index
      %c0_5 = arith.constant 0 : index
      %13 = vector.load %arg10[%c0, %c0_5] : memref<128x128xf32, #tpu.memory_space<vmem>>, vector<128x128xf32>
      tpu.vector_store %arg10[%c0, %c0_5], %12 {strides = array<i32>} : memref<128x128xf32, #tpu.memory_space<vmem>>, vector<128x128xf32>,
    } else {
    }
    %3 = arith.index_cast %arg0 : i32 to index
    %4 = arith.index_cast %arg1 : i32 to index
    %5 = memref.load %arg2[%3, %4] : memref<1x1xi32, #tpu.memory_space<smem>>
    %c0_i32_1 = arith.constant 0 : i32
    %6 = arith.cmpi sgt, %5, %c0_i32_1 : i32
    %7 = arith.extui %6 : i1 to i32
    %c0_i32_2 = arith.constant 0 : i32
    %8 = arith.cmpi ne, %7, %c0_i32_2 : i32
    scf.if %8 {
      %c128_i32 = arith.constant 128 : i32
      %12 = arith.muli %arg1, %c128_i32 : i32
      %13 = tpu.assume_multiple %12, 128 : i32
      %14 = arith.index_cast %13 : i32 to index
      %c0 = arith.constant 0 : index
      %15 = vector.load %arg5[%14, %c0] : memref<128x128xbf16, #tpu.memory_space<vmem>>, vector<128x128xbf16>
      %c0_5 = arith.constant 0 : index
      %c0_6 = arith.constant 0 : index
      %16 = vector.load %arg10[%c0_5, %c0_6] : memref<128x128xf32, #tpu.memory_space<vmem>>, vector<128x128xf32>
      %c0_7 = arith.constant 0 : index
      %c0_8 = arith.constant 0 : index
      %17 = vector.load %arg4[%c0_7, %c0_8] : memref<128x128xbf16, #tpu.memory_space<vmem>>, vector<128x128xbf16>
      %cst = arith.constant dense<0.000000e+00> : vector<128x128xf32>
      %18 = tpu.matmul %17, %15, %cst {dimension_numbers = #tpu.dot_dimension_numbers<[1], [0], [0], [1], [0, 0, 1, 1], [], []>} : vector<128x128xbf16>, vector<128x128xbf16>, vector<128x128xf32> -> vector<128x128xf32>
      %19 = arith.addf %16, %18 : vector<128x128xf32>
      %c0_9 = arith.constant 0 : index
      %c0_10 = arith.constant 0 : index
      %20 = vector.load %arg10[%c0_9, %c0_10] : memref<128x128xf32, #tpu.memory_space<vmem>>, vector<128x128xf32>
      tpu.vector_store %arg10[%c0_9, %c0_10], %19 {strides = array<i32>} : memref<128x128xf32, #tpu.memory_space<vmem>>, vector<128x128xf32>,
    } else {
    }
    %c0_i32_3 = arith.constant 0 : i32
    %9 = arith.cmpi eq, %arg1, %c0_i32_3 : i32
    %10 = arith.extui %9 : i1 to i32
    %c0_i32_4 = arith.constant 0 : i32
    %11 = arith.cmpi ne, %10, %c0_i32_4 : i32
    scf.if %11 {
      %c0 = arith.constant 0 : index
      %c0_5 = arith.constant 0 : index
      %12 = vector.load %arg10[%c0, %c0_5] : memref<128x128xf32, #tpu.memory_space<vmem>>, vector<128x128xf32>
      %c0_6 = arith.constant 0 : index
      %c0_7 = arith.constant 0 : index
      %13 = vector.load %arg6[%c0_6, %c0_7] : memref<1x128xf32, #tpu.memory_space<vmem>>, vector<1x128xf32>
      %14 = vector.broadcast %13 : vector<1x128xf32> to vector<128x128xf32>
      %15 = arith.addf %12, %14 : vector<128x128xf32>
      %cst = arith.constant 0.000000e+00 : f32
      %16 = vector.broadcast %cst : f32 to vector<128x128xf32>
      %17 = arith.maximumf %15, %16 : vector<128x128xf32>
      %c0_8 = arith.constant 0 : index
      %c0_9 = arith.constant 0 : index
      %18 = vector.load %arg7[%c0_8, %c0_9] : memref<128x128xf32, #tpu.memory_space<vmem>>, vector<128x128xf32>
      %cst_10 = arith.constant dense<0.000000e+00> : vector<128x128xf32>
      %19 = tpu.matmul %17, %18, %cst_10 {dimension_numbers = #tpu.dot_dimension_numbers<[1], [0], [0], [1], [0, 0, 1, 1], [], []>} : vector<128x128xf32>, vector<128x128xf32>, vector<128x128xf32> -> vector<128x128xf32>
      %c0_11 = arith.constant 0 : index
      %c0_12 = arith.constant 0 : index
      %20 = vector.load %arg8[%c0_11, %c0_12] : memref<1x128xf32, #tpu.memory_space<vmem>>, vector<1x128xf32>
      %21 = vector.broadcast %20 : vector<1x128xf32> to vector<128x128xf32>
      %22 = arith.addf %19, %21 : vector<128x128xf32>
      %23 = tpu.iota {dimensions = array<i32: 1>} : vector<128x128xi32>
      %c4_i32 = arith.constant 4 : i32
      %24 = vector.broadcast %c4_i32 : i32 to vector<128x128xi32>
      %25 = arith.cmpi slt, %23, %24 : vector<128x128xi32>
      %cst_13 = arith.constant 0xFF800000 : f32
      %26 = vector.broadcast %cst_13 : f32 to vector<128x128xf32>
      %27 = arith.select %25, %22, %26 : vector<128x128xi1>, vector<128x128xf32>
      %cst_14 = arith.constant dense<0xFF800000> : vector<128xf32>
      %28 = vector.multi_reduction <maximumf>, %27, %cst_14 [1] : vector<128x128xf32> to vector<128xf32>
      %29 = vector.shape_cast %28 : vector<128xf32> to vector<128x1xf32>
      %30 = vector.broadcast %29 : vector<128x1xf32> to vector<128x128xf32>
      %31 = arith.subf %27, %30 : vector<128x128xf32>
      %32 = math.exp %31 : vector<128x128xf32>
      %cst_15 = arith.constant dense<0.000000e+00> : vector<128xf32>
      %33 = vector.multi_reduction <add>, %32, %cst_15 [1] : vector<128x128xf32> to vector<128xf32>
      %34 = vector.shape_cast %33 : vector<128xf32> to vector<128x1xf32>
      %35 = math.log %34 : vector<128x1xf32>
      %36 = vector.broadcast %35 : vector<128x1xf32> to vector<128x128xf32>
      %37 = arith.subf %31, %36 : vector<128x128xf32>
      %c0_16 = arith.constant 0 : index
      %c0_17 = arith.constant 0 : index
      %38 = vector.load %arg9[%c0_16, %c0_17] : memref<128x128xf32, #tpu.memory_space<vmem>>, vector<128x128xf32>
      tpu.vector_store %arg9[%c0_16, %c0_17], %37 {strides = array<i32>} : memref<128x128xf32, #tpu.memory_space<vmem>>, vector<128x128xf32>,
    } else {
    }
    return
  }
  func.func @transform_0(%arg0: i32, %arg1: i32, %arg2: memref<1x1xi32, #tpu.memory_space<smem>>, %arg3: memref<1x1xi32, #tpu.memory_space<smem>>) -> (i32, i32) {
    %0 = arith.index_cast %arg0 : i32 to index
    %1 = arith.index_cast %arg1 : i32 to index
    %2 = memref.load %arg3[%0, %1] : memref<1x1xi32, #tpu.memory_space<smem>>
    %c0_i32 = arith.constant 0 : i32
    return %arg0, %2 : i32, i32
  }
  func.func @transform_1(%arg0: i32, %arg1: i32, %arg2: memref<1x1xi32, #tpu.memory_space<smem>>, %arg3: memref<1x1xi32, #tpu.memory_space<smem>>) -> (i32, i32) {
    %c0_i32 = arith.constant 0 : i32
    %c0_i32_0 = arith.constant 0 : i32
    %c0_i32_1 = arith.constant 0 : i32
    return %c0_i32, %c0_i32_0 : i32, i32
  }
  func.func @transform_2(%arg0: i32, %arg1: i32, %arg2: memref<1x1xi32, #tpu.memory_space<smem>>, %arg3: memref<1x1xi32, #tpu.memory_space<smem>>) -> (i32, i32) {
    %c0_i32 = arith.constant 0 : i32
    %c0_i32_0 = arith.constant 0 : i32
    %c0_i32_1 = arith.constant 0 : i32
    return %c0_i32, %c0_i32_0 : i32, i32
  }
  func.func @transform_3(%arg0: i32, %arg1: i32, %arg2: memref<1x1xi32, #tpu.memory_space<smem>>, %arg3: memref<1x1xi32, #tpu.memory_space<smem>>) -> (i32, i32) {
    %c0_i32 = arith.constant 0 : i32
    %c0_i32_0 = arith.constant 0 : i32
    %c0_i32_1 = arith.constant 0 : i32
    return %c0_i32, %c0_i32_0 : i32, i32
  }
  func.func @transform_4(%arg0: i32, %arg1: i32, %arg2: memref<1x1xi32, #tpu.memory_space<smem>>, %arg3: memref<1x1xi32, #tpu.memory_space<smem>>) -> (i32, i32) {
    %c0_i32 = arith.constant 0 : i32
    %c0_i32_0 = arith.constant 0 : i32
    %c0_i32_1 = arith.constant 0 : i32
    return %c0_i32, %c0_i32_0 : i32, i32
  }
  func.func @transform_5(%arg0: i32, %arg1: i32, %arg2: memref<1x1xi32, #tpu.memory_space<smem>>, %arg3: memref<1x1xi32, #tpu.memory_space<smem>>) -> (i32, i32) {
    %c0_i32 = arith.constant 0 : i32
    %c0_i32_0 = arith.constant 0 : i32
    return %arg0, %c0_i32 : i32, i32
  }
}

</mosaic_0001>

<bundles_post_ra>
// kernel: gcn2layer_sparse_forward.3
= control target key start
LH: loop header
LB: loop body
LE: loop exit
PB: predicated region body
PF: predicated region fallthrough
CT: control target
= control target key end

     0   :  { %s622_s1 = inlined_call_operand.vmem [shape: f32[128,128], index: 1, kind: input, shape index: {}]   ;;  %s623_s0 = inlined_call_operand.vmem [shape: f32[128,128], index: 0, kind: input, shape index: {}]   ;;  %s624_s2 = inlined_call_operand.vmem [shape: bf16[128,128], index: 2, kind: output, shape index: {}]  }
   0x1   :  { %v27_v0 = vld [vmem:[%s622_s1] sm:$0xff]  ;;  %v28_v1 = vld [vmem:[%s622_s1 + $0x8] sm:$0xff]  ;;  %v29_v2 = vld [vmem:[%s622_s1 + $0x10] sm:$0xff] }
   0x2   :  { %v439_v3 = vpack.c.bf16 %v28_v1, %v27_v0  ;;  %v30_v4 = vld [vmem:[%s622_s1 + $0x18] sm:$0xff]  ;;  %v31_v6 = vld [vmem:[%s622_s1 + $0x20] sm:$0xff]  ;;  %v32_v7 = vld [vmem:[%s622_s1 + $0x28] sm:$0xff] }
   0x3   :  { %v443_v5 = vpack.c.bf16 %v30_v4, %v29_v2  ;;  %v447_v8 = vpack.c.bf16 %v32_v7, %v31_v6  ;;  %v11_v9 = vld [vmem:[%s623_s0] sm:$0xff]  ;;  %v33_v11 = vld [vmem:[%s622_s1 + $0x30] sm:$0xff]  ;;  %v34_v12 = vld [vmem:[%s622_s1 + $0x38] sm:$0xff] }
   0x4   :  { %440 = vmatprep.subr.bf16.mxu0 %v439_v3  ;;  %471 = vmatprep.subr.bf16.mxu1 %v439_v3  ;;  %v19_v10 = vld [vmem:[%s623_s0 + $0x40] sm:$0xff]  ;;  %v451_v13 = vpack.c.bf16 %v34_v12, %v33_v11  ;;  %v36_v15 = vld [vmem:[%s622_s1 + $0x48] sm:$0xff]  ;;  %v37_v17 = vld [vmem:[%s622_s1 + $0x50] sm:$0xff] }
   0x5   :  { %442 = vmatpush3.bf16.msra.mxu0 %v439_v3  ;;  %479 = vmatpush3.bf16.msra.mxu1 %v439_v3  ;;  %v35_v14 = vld [vmem:[%s622_s1 + $0x40] sm:$0xff]  ;;  %v38_v18 = vld [vmem:[%s622_s1 + $0x58] sm:$0xff]  ;;  %v40_v21 = vld [vmem:[%s622_s1 + $0x68] sm:$0xff] }
   0x6   :  { %444 = vmatprep.subr.bf16.mxu0 %v443_v5  ;;  %472 = vmatprep.subr.bf16.mxu1 %v443_v5  ;;  %v455_v16 = vpack.c.bf16 %v36_v15, %v35_v14  ;;  %v459_v19 = vpack.c.bf16 %v38_v18, %v37_v17  ;;  %v39_v20 = vld [vmem:[%s622_s1 + $0x60] sm:$0xff]  ;;  %v41_v23 = vld [vmem:[%s622_s1 + $0x70] sm:$0xff]  ;;  %v42_v24 = vld [vmem:[%s622_s1 + $0x78] sm:$0xff] }
   0x7   :  { %415 = vmatprep.mubr.f32.mxu0 %v11_v9  ;;  %427 = vmatprep.mubr.f32.mxu1 %v19_v10  ;;  %v463_v22 = vpack.c.bf16 %v40_v21, %v39_v20  ;;  %v467_v25 = vpack.c.bf16 %v42_v24, %v41_v23  ;;  %v12_v26 = vld [vmem:[%s623_s0 + $0x8] sm:$0xff]  ;;  %v13_v28 = vld [vmem:[%s623_s0 + $0x10] sm:$0xff]  ;;  %v14_v30 = vld [vmem:[%s623_s0 + $0x18] sm:$0xff] }
   0x8   :  { %v20_v27 = vld [vmem:[%s623_s0 + $0x48] sm:$0xff]  ;;  %v21_v29 = vld [vmem:[%s623_s0 + $0x50] sm:$0xff]  ;;  %v22_v31 = vld [vmem:[%s623_s0 + $0x58] sm:$0xff] }
   0x9   :  { %446 = vmatpush3.bf16.msra.mxu0 %v443_v5  ;;  %480 = vmatpush3.bf16.msra.mxu1 %v443_v5  ;;  %v15_v32 = vld [vmem:[%s623_s0 + $0x20] sm:$0xff]  ;;  %v16_v34 = vld [vmem:[%s623_s0 + $0x28] sm:$0xff]  ;;  %v17_v36 = vld [vmem:[%s623_s0 + $0x30] sm:$0xff] }
   0xa   :  { %448 = vmatprep.subr.bf16.mxu0 %v447_v8  ;;  %473 = vmatprep.subr.bf16.mxu1 %v447_v8  ;;  %v23_v33 = vld [vmem:[%s623_s0 + $0x60] sm:$0xff]  ;;  %v24_v35 = vld [vmem:[%s623_s0 + $0x68] sm:$0xff]  ;;  %v25_v37 = vld [vmem:[%s623_s0 + $0x70] sm:$0xff] }
   0xb   :  { %v18_v38 = vld [vmem:[%s623_s0 + $0x38] sm:$0xff] }
   0xc   :  { %v26_v39 = vld [vmem:[%s623_s0 + $0x78] sm:$0xff] }
   0xd   :  { %450 = vmatpush3.bf16.msra.mxu0 %v447_v8  ;;  %481 = vmatpush3.bf16.msra.mxu1 %v447_v8 }
   0xe   :  { %452 = vmatprep.subr.bf16.mxu0 %v451_v13  ;;  %474 = vmatprep.subr.bf16.mxu1 %v451_v13 }
  0x11   :  { %454 = vmatpush3.bf16.msra.mxu0 %v451_v13  ;;  %482 = vmatpush3.bf16.msra.mxu1 %v451_v13 }
  0x12   :  { %456 = vmatprep.subr.bf16.mxu0 %v455_v16  ;;  %475 = vmatprep.subr.bf16.mxu1 %v455_v16 }
  0x15   :  { %458 = vmatpush3.bf16.msra.mxu0 %v455_v16  ;;  %483 = vmatpush3.bf16.msra.mxu1 %v455_v16 }
  0x16   :  { %460 = vmatprep.subr.bf16.mxu0 %v459_v19  ;;  %476 = vmatprep.subr.bf16.mxu1 %v459_v19 }
  0x19   :  { %462 = vmatpush3.bf16.msra.mxu0 %v459_v19  ;;  %484 = vmatpush3.bf16.msra.mxu1 %v459_v19 }
  0x1a   :  { %464 = vmatprep.subr.bf16.mxu0 %v463_v22  ;;  %477 = vmatprep.subr.bf16.mxu1 %v463_v22 }
  0x1d   :  { %466 = vmatpush3.bf16.msra.mxu0 %v463_v22  ;;  %485 = vmatpush3.bf16.msra.mxu1 %v463_v22 }
  0x1e   :  { %468 = vmatprep.subr.bf16.mxu0 %v467_v25  ;;  %478 = vmatprep.subr.bf16.mxu1 %v467_v25 }
  0x21   :  { %470 = vmatpush3.bf16.msra.mxu0 %v467_v25  ;;  %486 = vmatpush3.bf16.msra.mxu1 %v467_v25 }
  0x24   :  { %416 = vmatmul.mubr.f32.vlgmr.msra.gmra.mrb[0].mxu0 %v12_v26  ;;  %428 = vmatmul.mubr.f32.vlgmr.msra.gmra.mrb[0].mxu1 %v20_v27 }
  0x25   :  { %418 = vmatprep.mubr.f32.mxu0 %v13_v28  ;;  %430 = vmatprep.mubr.f32.mxu1 %v21_v29 }
  0x28   :  { %419 = vmatmul.mubr.f32.gmra.mrb[2].mxu0 %v14_v30  ;;  %431 = vmatmul.mubr.f32.gmra.mrb[2].mxu1 %v22_v31 }
  0x29   :  { %421 = vmatprep.mubr.f32.mxu0 %v15_v32  ;;  %433 = vmatprep.mubr.f32.mxu1 %v23_v33 }
  0x2c   :  { %422 = vmatmul.mubr.f32.gmra.mrb[4].mxu0 %v16_v34  ;;  %434 = vmatmul.mubr.f32.gmra.mrb[4].mxu1 %v24_v35 }
  0x2d   :  { %424 = vmatprep.mubr.f32.mxu0 %v17_v36  ;;  %436 = vmatprep.mubr.f32.mxu1 %v25_v37 }
  0x30   :  { %425 = vmatmul.mubr.f32.gmra.mrb[6].mxu0 %v18_v38  ;;  %437 = vmatmul.mubr.f32.gmra.mrb[6].mxu1 %v26_v39 }
  0xf7   :  { %v417_v40 = vpop.f32.mrb[0].mxu0  ;;  %v429_v41 = vpop.f32.mrb[0].mxu1 }
  0xf8   :  { %v109_v42 = vpop.f32.mrb[1].mxu0  ;;  %v149_v43 = vpop.f32.mrb[1].mxu1 }
  0xf9   :  { %v307_v44 = vpack.c.bf16 %v417_v40, %v109_v42  ;;  %v327_v45 = vpack.c.bf16 %v429_v41, %v149_v43 }
  0xfb   :  { %308 = vst [vmem:[%s624_s2] sm:$0xff] %v307_v44   ;;  %347 = vst [vmem:[%s624_s2 + $0x20] sm:$0xff] %v327_v45   ;;  %v420_v46 = vpop.f32.mrb[2].mxu0  ;;  %v432_v47 = vpop.f32.mrb[2].mxu1 }
  0xfc   :  { %v119_v48 = vpop.f32.mrb[3].mxu0  ;;  %v159_v49 = vpop.f32.mrb[3].mxu1 }
  0xfd   :  { %v312_v50 = vpack.c.bf16 %v420_v46, %v119_v48  ;;  %v332_v51 = vpack.c.bf16 %v432_v47, %v159_v49 }
  0xff   :  { %344 = vst [vmem:[%s624_s2 + $0x8] sm:$0xff] %v312_v50   ;;  %348 = vst [vmem:[%s624_s2 + $0x28] sm:$0xff] %v332_v51   ;;  %v423_v52 = vpop.f32.mrb[4].mxu0  ;;  %v435_v53 = vpop.f32.mrb[4].mxu1 }
 0x100   :  { %v129_v54 = vpop.f32.mrb[5].mxu0  ;;  %v169_v55 = vpop.f32.mrb[5].mxu1 }
 0x101   :  { %v317_v56 = vpack.c.bf16 %v423_v52, %v129_v54  ;;  %v337_v57 = vpack.c.bf16 %v435_v53, %v169_v55 }
 0x103   :  { %345 = vst [vmem:[%s624_s2 + $0x10] sm:$0xff] %v317_v56   ;;  %349 = vst [vmem:[%s624_s2 + $0x30] sm:$0xff] %v337_v57   ;;  %v426_v58 = vpop.f32.mrb[6].mxu0  ;;  %v438_v59 = vpop.f32.mrb[6].mxu1 }
 0x104   :  { %v139_v60 = vpop.f32.mrb[7].mxu0  ;;  %v179_v61 = vpop.f32.mrb[7].mxu1 }
 0x105   :  { %v322_v62 = vpack.c.bf16 %v426_v58, %v139_v60  ;;  %v342_v63 = vpack.c.bf16 %v438_v59, %v179_v61 }
 0x107   :  { %346 = vst [vmem:[%s624_s2 + $0x18] sm:$0xff] %v322_v62   ;;  %350 = vst [vmem:[%s624_s2 + $0x38] sm:$0xff] %v342_v63  }

// kernel: gcn2layer_sparse_forward.4
= control target key start
LH: loop header
LB: loop body
LE: loop exit
PB: predicated region body
PF: predicated region fallthrough
CT: control target
= control target key end

     0   :  { %v986_v0 = vmov 0.0   ;;  %s1165_s0 = inlined_call_operand.<no memory space> [shape: s32[1,1], index: 0, kind: input, shape index: {}]   ;;  %s1166_s1 = inlined_call_operand.<no memory space> [shape: s32[1,1], index: 1, kind: input, shape index: {}]   ;;  %s1167_s3 = inlined_call_operand.vmem [shape: bf16[128,128], index: 3, kind: input, shape index: {}]   ;;  %s1168_s4 = inlined_call_operand.vmem [shape: f32[1,128], index: 4, kind: input, shape index: {}]   ;;  %s1169_s5 = inlined_call_operand.vmem [shape: f32[128,128], index: 5, kind: input, shape index: {}]   ;;  %s1170_s6 = inlined_call_operand.vmem [shape: bf16[128,128], index: 6, kind: output, shape index: {}]   ;;  %s1171_s2 = inlined_call_operand.vmem [shape: bf16[128,128], index: 2, kind: input, shape index: {}]  }
   0x1   :  { %p45_p0 = scmp.lt.s32.totalorder %s1166_s1, 0  ;;  %58 = vst [vmem:[#allocation2] sm:$0xff] %v986_v0  ;;  %59 = vst [vmem:[#allocation2 + $0x8] sm:$0xff] %v986_v0  ;;  %p672_p1 = scmp.le.s32.totalorder %s1165_s0, 0 }
   0x2   :  { %60 = vst [vmem:[#allocation2 + $0x10] sm:$0xff] %v986_v0  ;;  %61 = vst [vmem:[#allocation2 + $0x18] sm:$0xff] %v986_v0  ;;  %v970_v1 = vld [vmem:[%s1167_s3] sm:$0xff] (!%p672_p1)   ;;  %v971_v2 = vld [vmem:[%s1167_s3 + $0x8] sm:$0xff] (!%p672_p1)  }
   0x3   :  { %62 = vst [vmem:[#allocation2 + $0x20] sm:$0xff] %v986_v0  ;;  %63 = vst [vmem:[#allocation2 + $0x28] sm:$0xff] %v986_v0  ;;  %s1173_s1 = smov (!%p45_p0, %s1166_s1), 0  ;;  %81 = sbr.rel (%p672_p1) target bundleno = 262 (0x106), region = 25 }
   0x4   :  { %64 = vst [vmem:[#allocation2 + $0x30] sm:$0xff] %v986_v0  ;;  %65 = vst [vmem:[#allocation2 + $0x38] sm:$0xff] %v986_v0  ;;  %s671_s27 = sshll.u32 %s1173_s1, 2  ;;  %817 = vmatprep.subr.bf16.mxu0 (!%p672_p1), %v970_v1  ;;  %937 = vmatprep.subr.bf16.mxu1 (!%p672_p1), %v970_v1  ;;  %v972_v3 = vld [vmem:[%s1167_s3 + $0x10] sm:$0xff] (!%p672_p1)   ;;  %v973_v4 = vld [vmem:[%s1167_s3 + $0x18] sm:$0xff] (!%p672_p1)  }
   0x5   :  { %66 = vst [vmem:[#allocation2 + $0x40] sm:$0xff] %v986_v0  ;;  %67 = vst [vmem:[#allocation2 + $0x48] sm:$0xff] %v986_v0  ;;  %s1035_s30 = scalar_lea.vmem %s1171_s2, %s671_s27  ;;  %818 = vmatpush3.bf16.msra.mxu0 (!%p672_p1), %v970_v1  ;;  %945 = vmatpush3.bf16.msra.mxu1 (!%p672_p1), %v970_v1  ;;  %v974_v7 = vld [vmem:[%s1167_s3 + $0x20] sm:$0xff] (!%p672_p1)   ;;  %v975_v8 = vld [vmem:[%s1167_s3 + $0x28] sm:$0xff] (!%p672_p1)  }
   0x6   :  { %68 = vst [vmem:[#allocation2 + $0x50] sm:$0xff] %v986_v0  ;;  %69 = vst [vmem:[#allocation2 + $0x58] sm:$0xff] %v986_v0  ;;  %819 = vmatprep.subr.bf16.mxu0 (!%p672_p1), %v971_v2  ;;  %938 = vmatprep.subr.bf16.mxu1 (!%p672_p1), %v971_v2  ;;  %v978_v5 = vld [vmem:[%s1035_s30] sm:$0xff] (!%p672_p1)   ;;  %v976_v9 = vld [vmem:[%s1167_s3 + $0x30] sm:$0xff] (!%p672_p1)  }
   0x7   :  { %70 = vst [vmem:[#allocation2 + $0x60] sm:$0xff] %v986_v0  ;;  %71 = vst [vmem:[#allocation2 + $0x68] sm:$0xff] %v986_v0  ;;  %v979_v6 = vld [vmem:[%s1035_s30 + $0x20] sm:$0xff] (!%p672_p1)   ;;  %833 = vmatprep.mubr.bf16.mxu0 (!%p672_p1), %v978_v5  ;;  %v977_v10 = vld [vmem:[%s1167_s3 + $0x38] sm:$0xff] (!%p672_p1)  }
   0x8   :  { %72 = vst [vmem:[#allocation2 + $0x70] sm:$0xff] %v986_v0  ;;  %73 = vst [vmem:[#allocation2 + $0x78] sm:$0xff] %v986_v0  ;;  %841 = vmatprep.mubr.bf16.mxu1 (!%p672_p1), %v979_v6  ;;  %v980_v11 = vld [vmem:[%s1035_s30 + $0x8] sm:$0xff] (!%p672_p1)   ;;  %v982_v13 = vld [vmem:[%s1035_s30 + $0x10] sm:$0xff] (!%p672_p1)  }
   0x9   :  { %820 = vmatpush3.bf16.msra.mxu0 (!%p672_p1), %v971_v2  ;;  %946 = vmatpush3.bf16.msra.mxu1 (!%p672_p1), %v971_v2  ;;  %v981_v12 = vld [vmem:[%s1035_s30 + $0x28] sm:$0xff] (!%p672_p1)   ;;  %v983_v14 = vld [vmem:[%s1035_s30 + $0x30] sm:$0xff] (!%p672_p1)   ;;  %v984_v15 = vld [vmem:[%s1035_s30 + $0x18] sm:$0xff] (!%p672_p1)  }
   0xa   :  { %821 = vmatprep.subr.bf16.mxu0 %v972_v3  ;;  %939 = vmatprep.subr.bf16.mxu1 %v972_v3  ;;  %v985_v16 = vld [vmem:[%s1035_s30 + $0x38] sm:$0xff]   ;;  %v105_v17 = vld [vmem:[#allocation2 + $0x10] sm:$0xff]  ;;  %v103_v19 = vld [vmem:[#allocation2] sm:$0xff] }
   0xb   :  { %v106_v23 = vld [vmem:[#allocation2 + $0x18] sm:$0xff]  ;;  %v104_v29 = vld [vmem:[#allocation2 + $0x8] sm:$0xff]  ;;  %v109_v41 = vld [vmem:[#allocation2 + $0x30] sm:$0xff] }
   0xc   :  { %v111_v20 = vld [vmem:[#allocation2 + $0x40] sm:$0xff]  ;;  %v112_v30 = vld [vmem:[#allocation2 + $0x48] sm:$0xff]  ;;  %v110_v47 = vld [vmem:[#allocation2 + $0x38] sm:$0xff] }
   0xd   :  { %822 = vmatpush3.bf16.msra.mxu0 %v972_v3  ;;  %947 = vmatpush3.bf16.msra.mxu1 %v972_v3  ;;  %v113_v18 = vld [vmem:[#allocation2 + $0x50] sm:$0xff]  ;;  %v114_v24 = vld [vmem:[#allocation2 + $0x58] sm:$0xff]  ;;  %v107_v43 = vld [vmem:[#allocation2 + $0x20] sm:$0xff] }
   0xe   :  { %823 = vmatprep.subr.bf16.mxu0 %v973_v4  ;;  %940 = vmatprep.subr.bf16.mxu1 %v973_v4  ;;  %v115_v44 = vld [vmem:[#allocation2 + $0x60] sm:$0xff]  ;;  %v108_v53 = vld [vmem:[#allocation2 + $0x28] sm:$0xff] }
   0xf   :  { %v117_v42 = vld [vmem:[#allocation2 + $0x70] sm:$0xff]  ;;  %v118_v48 = vld [vmem:[#allocation2 + $0x78] sm:$0xff]  ;;  %v116_v54 = vld [vmem:[#allocation2 + $0x68] sm:$0xff] }
  0x11   :  { %824 = vmatpush3.bf16.msra.mxu0 %v973_v4  ;;  %948 = vmatpush3.bf16.msra.mxu1 %v973_v4 }
  0x12   :  { %825 = vmatprep.subr.bf16.mxu0 %v974_v7  ;;  %941 = vmatprep.subr.bf16.mxu1 %v974_v7 }
  0x15   :  { %826 = vmatpush3.bf16.msra.mxu0 %v974_v7  ;;  %949 = vmatpush3.bf16.msra.mxu1 %v974_v7 }
  0x16   :  { %827 = vmatprep.subr.bf16.mxu0 %v975_v8  ;;  %942 = vmatprep.subr.bf16.mxu1 %v975_v8 }
  0x19   :  { %828 = vmatpush3.bf16.msra.mxu0 %v975_v8  ;;  %950 = vmatpush3.bf16.msra.mxu1 %v975_v8 }
  0x1a   :  { %829 = vmatprep.subr.bf16.mxu0 %v976_v9  ;;  %943 = vmatprep.subr.bf16.mxu1 %v976_v9 }
  0x1d   :  { %830 = vmatpush3.bf16.msra.mxu0 %v976_v9  ;;  %951 = vmatpush3.bf16.msra.mxu1 %v976_v9 }
  0x1e   :  { %831 = vmatprep.subr.bf16.mxu0 %v977_v10  ;;  %944 = vmatprep.subr.bf16.mxu1 %v977_v10 }
  0x21   :  { %832 = vmatpush3.bf16.msra.mxu0 %v977_v10  ;;  %952 = vmatpush3.bf16.msra.mxu1 %v977_v10 }
  0x24   :  { %834 = vmatmul.mubr.bf16.vlgmr.msra.gmra.mrb[0].mxu0 %v980_v11  ;;  %842 = vmatmul.mubr.bf16.vlgmr.msra.gmra.mrb[0].mxu1 %v981_v12 }
  0x25   :  { %837 = vmatprep.mubr.bf16.mxu0 %v982_v13  ;;  %845 = vmatprep.mubr.bf16.mxu1 %v983_v14 }
  0x2c   :  { %838 = vmatmul.mubr.bf16.gmra.mrb[4].mxu0 %v984_v15  ;;  %846 = vmatmul.mubr.bf16.gmra.mrb[4].mxu1 %v985_v16 }
  0xf7   :  { %v835_v21 = vpop.f32.mrb[0].mxu0  ;;  %v843_v22 = vpop.f32.mrb[0].mxu1 }
  0xf8   :  { %v330_v25 = vadd.f32 %v835_v21, %v105_v17  ;;  %v338_v26 = vadd.f32 %v843_v22, %v113_v18  ;;  %v265_v27 = vpop.f32.mrb[1].mxu0  ;;  %v297_v28 = vpop.f32.mrb[1].mxu1 }
  0xf9   :  { %v328_v31 = vadd.f32 %v265_v27, %v103_v19  ;;  %v336_v32 = vadd.f32 %v297_v28, %v111_v20  ;;  %v836_v33 = vpop.f32.mrb[2].mxu0  ;;  %v844_v34 = vpop.f32.mrb[2].mxu1 }
  0xfa   :  { %346 = vst [vmem:[#allocation2 + $0x10] sm:$0xff] %v330_v25  ;;  %354 = vst [vmem:[#allocation2 + $0x50] sm:$0xff] %v338_v26  ;;  %v331_v35 = vadd.f32 %v836_v33, %v106_v23  ;;  %v339_v36 = vadd.f32 %v844_v34, %v114_v24  ;;  %v268_v37 = vpop.f32.mrb[3].mxu0  ;;  %v300_v38 = vpop.f32.mrb[3].mxu1 }
  0xfb   :  { %344 = vst [vmem:[#allocation2] sm:$0xff] %v328_v31  ;;  %352 = vst [vmem:[#allocation2 + $0x40] sm:$0xff] %v336_v32  ;;  %v329_v39 = vadd.f32 %v268_v37, %v104_v29  ;;  %v337_v40 = vadd.f32 %v300_v38, %v112_v30 }
  0xfc   :  { %347 = vst [vmem:[#allocation2 + $0x18] sm:$0xff] %v331_v35  ;;  %355 = vst [vmem:[#allocation2 + $0x58] sm:$0xff] %v339_v36 }
  0xfd   :  { %345 = vst [vmem:[#allocation2 + $0x8] sm:$0xff] %v329_v39  ;;  %353 = vst [vmem:[#allocation2 + $0x48] sm:$0xff] %v337_v40 }
  0xff   :  { %v839_v45 = vpop.f32.mrb[4].mxu0  ;;  %v847_v46 = vpop.f32.mrb[4].mxu1 }
 0x100   :  { %v334_v49 = vadd.f32 %v839_v45, %v109_v41  ;;  %v342_v50 = vadd.f32 %v847_v46, %v117_v42  ;;  %v281_v51 = vpop.f32.mrb[5].mxu0  ;;  %v313_v52 = vpop.f32.mrb[5].mxu1 }
 0x101   :  { %v332_v55 = vadd.f32 %v281_v51, %v107_v43  ;;  %v340_v56 = vadd.f32 %v313_v52, %v115_v44  ;;  %v840_v57 = vpop.f32.mrb[6].mxu0  ;;  %v848_v58 = vpop.f32.mrb[6].mxu1 }
 0x102   :  { %350 = vst [vmem:[#allocation2 + $0x30] sm:$0xff] %v334_v49  ;;  %358 = vst [vmem:[#allocation2 + $0x70] sm:$0xff] %v342_v50  ;;  %v335_v59 = vadd.f32 %v840_v57, %v110_v47  ;;  %v343_v60 = vadd.f32 %v848_v58, %v118_v48  ;;  %v284_v61 = vpop.f32.mrb[7].mxu0  ;;  %v316_v62 = vpop.f32.mrb[7].mxu1 }
 0x103   :  { %348 = vst [vmem:[#allocation2 + $0x20] sm:$0xff] %v332_v55  ;;  %356 = vst [vmem:[#allocation2 + $0x60] sm:$0xff] %v340_v56  ;;  %v333_v63 = vadd.f32 %v284_v61, %v108_v53  ;;  %v341_v0 = vadd.f32 %v316_v62, %v116_v54 }
 0x104   :  { %351 = vst [vmem:[#allocation2 + $0x38] sm:$0xff] %v335_v59  ;;  %359 = vst [vmem:[#allocation2 + $0x78] sm:$0xff] %v343_v60 }
 0x105   :  { %349 = vst [vmem:[#allocation2 + $0x28] sm:$0xff] %v333_v63  ;;  %357 = vst [vmem:[#allocation2 + $0x68] sm:$0xff] %v341_v0 }
 0x106 PF:  { %v418_v1 = vld [vmem:[%s1169_s5] sm:$0xff]  ;;  %v419_v2 = vld [vmem:[%s1169_s5 + $0x8] sm:$0xff]  ;;  %v420_v3 = vld [vmem:[%s1169_s5 + $0x10] sm:$0xff] }
 0x107   :  { %v905_v4 = vpack.c.bf16 %v419_v2, %v418_v1  ;;  %v421_v5 = vld [vmem:[%s1169_s5 + $0x18] sm:$0xff]  ;;  %v422_v7 = vld [vmem:[%s1169_s5 + $0x20] sm:$0xff]  ;;  %v423_v8 = vld [vmem:[%s1169_s5 + $0x28] sm:$0xff] }
 0x108   :  { %v909_v6 = vpack.c.bf16 %v421_v5, %v420_v3  ;;  %v913_v9 = vpack.c.bf16 %v423_v8, %v422_v7  ;;  %v363_v10 = vld [vmem:[#allocation2] sm:$0xff]  ;;  %v424_v12 = vld [vmem:[%s1169_s5 + $0x30] sm:$0xff]  ;;  %v425_v13 = vld [vmem:[%s1169_s5 + $0x38] sm:$0xff] }
 0x109   :  { %906 = vmatprep.subr.bf16.mxu0 %v905_v4  ;;  %953 = vmatprep.subr.bf16.mxu1 %v905_v4  ;;  %v1093_v11 = vld [vmem:[%s1168_s4] ss:$0 sm:$0xff]  ;;  %v917_v18 = vpack.c.bf16 %v425_v13, %v424_v12  ;;  %v427_v21 = vld [vmem:[%s1169_s5 + $0x48] sm:$0xff]  ;;  %v428_v23 = vld [vmem:[%s1169_s5 + $0x50] sm:$0xff] }
 0x10a   :  { %908 = vmatpush3.bf16.msra.mxu0 %v905_v4  ;;  %961 = vmatpush3.bf16.msra.mxu1 %v905_v4  ;;  %v386_v14 = vadd.f32 %v1093_v11, %v363_v10  ;;  %v371_v15 = vld [vmem:[#allocation2 + $0x40] sm:$0xff]  ;;  %v429_v24 = vld [vmem:[%s1169_s5 + $0x58] sm:$0xff]  ;;  %v431_v27 = vld [vmem:[%s1169_s5 + $0x68] sm:$0xff] }
 0x10b   :  { %910 = vmatprep.subr.bf16.mxu0 %v909_v6  ;;  %954 = vmatprep.subr.bf16.mxu1 %v909_v6  ;;  %v394_v16 = vadd.f32 %v1093_v11, %v371_v15  ;;  %v426_v20 = vld [vmem:[%s1169_s5 + $0x40] sm:$0xff]  ;;  %v925_v25 = vpack.c.bf16 %v429_v24, %v428_v23  ;;  %v432_v29 = vld [vmem:[%s1169_s5 + $0x70] sm:$0xff]  ;;  %v433_v30 = vld [vmem:[%s1169_s5 + $0x78] sm:$0xff] }
 0x10c   :  { %v402_v17 = vmax.f32 %v386_v14, 0.0  ;;  %v921_v22 = vpack.c.bf16 %v427_v21, %v426_v20  ;;  %v430_v26 = vld [vmem:[%s1169_s5 + $0x60] sm:$0xff]  ;;  %v364_v31 = vld [vmem:[#allocation2 + $0x8] sm:$0xff]  ;;  %v933_v33 = vpack.c.bf16 %v433_v30, %v432_v29  ;;  %v365_v34 = vld [vmem:[#allocation2 + $0x10] sm:$0xff] }
 0x10d   :  { %v410_v19 = vmax.f32 %v394_v16, 0.0  ;;  %v929_v28 = vpack.c.bf16 %v431_v27, %v430_v26  ;;  %v372_v32 = vld [vmem:[#allocation2 + $0x48] sm:$0xff]  ;;  %v373_v35 = vld [vmem:[#allocation2 + $0x50] sm:$0xff]  ;;  %v387_v36 = vadd.f32 %v1093_v11, %v364_v31  ;;  %v388_v38 = vadd.f32 %v1093_v11, %v365_v34  ;;  %v366_v40 = vld [vmem:[#allocation2 + $0x18] sm:$0xff] }
 0x10e   :  { %912 = vmatpush3.bf16.msra.mxu0 %v909_v6  ;;  %962 = vmatpush3.bf16.msra.mxu1 %v909_v6  ;;  %v395_v37 = vadd.f32 %v1093_v11, %v372_v32  ;;  %v396_v39 = vadd.f32 %v1093_v11, %v373_v35  ;;  %v374_v41 = vld [vmem:[#allocation2 + $0x58] sm:$0xff]  ;;  %v367_v42 = vld [vmem:[#allocation2 + $0x20] sm:$0xff]  ;;  %v389_v46 = vadd.f32 %v1093_v11, %v366_v40  ;;  %v368_v52 = vld [vmem:[#allocation2 + $0x28] sm:$0xff] }
 0x10f   :  { %914 = vmatprep.subr.bf16.mxu0 %v913_v9  ;;  %955 = vmatprep.subr.bf16.mxu1 %v913_v9  ;;  %v375_v43 = vld [vmem:[#allocation2 + $0x60] sm:$0xff]  ;;  %v403_v44 = vmax.f32 %v387_v36, 0.0  ;;  %v397_v47 = vadd.f32 %v1093_v11, %v374_v41  ;;  %v404_v48 = vmax.f32 %v388_v38, 0.0  ;;  %v390_v50 = vadd.f32 %v1093_v11, %v367_v42  ;;  %v376_v53 = vld [vmem:[#allocation2 + $0x68] sm:$0xff]  ;;  %v369_v54 = vld [vmem:[#allocation2 + $0x30] sm:$0xff] }
 0x110   :  { %881 = vmatprep.mubr.f32.mxu0 %v402_v17  ;;  %893 = vmatprep.mubr.f32.mxu1 %v410_v19  ;;  %v411_v45 = vmax.f32 %v395_v37, 0.0  ;;  %v412_v49 = vmax.f32 %v396_v39, 0.0  ;;  %v398_v51 = vadd.f32 %v1093_v11, %v375_v43  ;;  %v377_v55 = vld [vmem:[#allocation2 + $0x70] sm:$0xff]  ;;  %v405_v56 = vmax.f32 %v389_v46, 0.0  ;;  %v370_v0 = vld [vmem:[#allocation2 + $0x38] sm:$0xff] }
 0x111   :  { %v413_v57 = vmax.f32 %v397_v47, 0.0  ;;  %v391_v58 = vadd.f32 %v1093_v11, %v368_v52  ;;  %v399_v59 = vadd.f32 %v1093_v11, %v376_v53  ;;  %v406_v60 = vmax.f32 %v390_v50, 0.0  ;;  %v378_v1 = vld [vmem:[#allocation2 + $0x78] sm:$0xff] }
 0x112   :  { %916 = vmatpush3.bf16.msra.mxu0 %v913_v9  ;;  %963 = vmatpush3.bf16.msra.mxu1 %v913_v9  ;;  %v414_v61 = vmax.f32 %v398_v51, 0.0  ;;  %v392_v62 = vadd.f32 %v1093_v11, %v369_v54  ;;  %v400_v63 = vadd.f32 %v1093_v11, %v377_v55  ;;  %v393_v4 = vadd.f32 %v1093_v11, %v370_v0 }
 0x113   :  { %918 = vmatprep.subr.bf16.mxu0 %v917_v18  ;;  %956 = vmatprep.subr.bf16.mxu1 %v917_v18  ;;  %v407_v2 = vmax.f32 %v391_v58, 0.0  ;;  %v415_v3 = vmax.f32 %v399_v59, 0.0  ;;  %v401_v5 = vadd.f32 %v1093_v11, %v378_v1 }
 0x114   :  { %v408_v6 = vmax.f32 %v392_v62, 0.0  ;;  %v416_v7 = vmax.f32 %v400_v63, 0.0  ;;  %v409_v8 = vmax.f32 %v393_v4, 0.0 }
 0x115   :  { %v417_v9 = vmax.f32 %v401_v5, 0.0 }
 0x116   :  { %920 = vmatpush3.bf16.msra.mxu0 %v917_v18  ;;  %964 = vmatpush3.bf16.msra.mxu1 %v917_v18 }
 0x117   :  { %922 = vmatprep.subr.bf16.mxu0 %v921_v22  ;;  %957 = vmatprep.subr.bf16.mxu1 %v921_v22 }
 0x11a   :  { %924 = vmatpush3.bf16.msra.mxu0 %v921_v22  ;;  %965 = vmatpush3.bf16.msra.mxu1 %v921_v22 }
 0x11b   :  { %926 = vmatprep.subr.bf16.mxu0 %v925_v25  ;;  %958 = vmatprep.subr.bf16.mxu1 %v925_v25 }
 0x11e   :  { %928 = vmatpush3.bf16.msra.mxu0 %v925_v25  ;;  %966 = vmatpush3.bf16.msra.mxu1 %v925_v25 }
 0x11f   :  { %930 = vmatprep.subr.bf16.mxu0 %v929_v28  ;;  %959 = vmatprep.subr.bf16.mxu1 %v929_v28 }
 0x122   :  { %932 = vmatpush3.bf16.msra.mxu0 %v929_v28  ;;  %967 = vmatpush3.bf16.msra.mxu1 %v929_v28 }
 0x123   :  { %934 = vmatprep.subr.bf16.mxu0 %v933_v33  ;;  %960 = vmatprep.subr.bf16.mxu1 %v933_v33 }
 0x126   :  { %936 = vmatpush3.bf16.msra.mxu0 %v933_v33  ;;  %968 = vmatpush3.bf16.msra.mxu1 %v933_v33 }
 0x129   :  { %882 = vmatmul.mubr.f32.vlgmr.msra.gmra.mrb[0].mxu0 %v403_v44  ;;  %894 = vmatmul.mubr.f32.vlgmr.msra.gmra.mrb[0].mxu1 %v411_v45 }
 0x12a   :  { %884 = vmatprep.mubr.f32.mxu0 %v404_v48  ;;  %896 = vmatprep.mubr.f32.mxu1 %v412_v49 }
 0x12d   :  { %885 = vmatmul.mubr.f32.gmra.mrb[2].mxu0 %v405_v56  ;;  %897 = vmatmul.mubr.f32.gmra.mrb[2].mxu1 %v413_v57 }
 0x12e   :  { %887 = vmatprep.mubr.f32.mxu0 %v406_v60  ;;  %899 = vmatprep.mubr.f32.mxu1 %v414_v61 }
 0x131   :  { %888 = vmatmul.mubr.f32.gmra.mrb[4].mxu0 %v407_v2  ;;  %900 = vmatmul.mubr.f32.gmra.mrb[4].mxu1 %v415_v3 }
 0x132   :  { %890 = vmatprep.mubr.f32.mxu0 %v408_v6  ;;  %902 = vmatprep.mubr.f32.mxu1 %v416_v7 }
 0x135   :  { %891 = vmatmul.mubr.f32.gmra.mrb[6].mxu0 %v409_v8  ;;  %903 = vmatmul.mubr.f32.gmra.mrb[6].mxu1 %v417_v9 }
 0x1fc   :  { %v883_v10 = vpop.f32.mrb[0].mxu0  ;;  %v895_v12 = vpop.f32.mrb[0].mxu1 }
 0x1fd   :  { %v500_v13 = vpop.f32.mrb[1].mxu0  ;;  %v540_v14 = vpop.f32.mrb[1].mxu1 }
 0x1fe   :  { %v725_v15 = vpack.c.bf16 %v883_v10, %v500_v13  ;;  %v745_v16 = vpack.c.bf16 %v895_v12, %v540_v14 }
 0x200   :  { %726 = vst [vmem:[%s1170_s6] sm:$0xff] %v725_v15   ;;  %765 = vst [vmem:[%s1170_s6 + $0x20] sm:$0xff] %v745_v16   ;;  %v886_v11 = vpop.f32.mrb[2].mxu0  ;;  %v898_v17 = vpop.f32.mrb[2].mxu1 }
 0x201   :  { %v510_v18 = vpop.f32.mrb[3].mxu0  ;;  %v550_v19 = vpop.f32.mrb[3].mxu1 }
 0x202   :  { %v730_v20 = vpack.c.bf16 %v886_v11, %v510_v18  ;;  %v750_v21 = vpack.c.bf16 %v898_v17, %v550_v19 }
 0x204   :  { %762 = vst [vmem:[%s1170_s6 + $0x8] sm:$0xff] %v730_v20   ;;  %766 = vst [vmem:[%s1170_s6 + $0x28] sm:$0xff] %v750_v21   ;;  %v889_v22 = vpop.f32.mrb[4].mxu0  ;;  %v901_v23 = vpop.f32.mrb[4].mxu1 }
 0x205   :  { %v520_v24 = vpop.f32.mrb[5].mxu0  ;;  %v560_v25 = vpop.f32.mrb[5].mxu1 }
 0x206   :  { %v735_v26 = vpack.c.bf16 %v889_v22, %v520_v24  ;;  %v755_v27 = vpack.c.bf16 %v901_v23, %v560_v25 }
 0x208   :  { %763 = vst [vmem:[%s1170_s6 + $0x10] sm:$0xff] %v735_v26   ;;  %767 = vst [vmem:[%s1170_s6 + $0x30] sm:$0xff] %v755_v27   ;;  %v892_v28 = vpop.f32.mrb[6].mxu0  ;;  %v904_v29 = vpop.f32.mrb[6].mxu1 }
 0x209   :  { %v530_v30 = vpop.f32.mrb[7].mxu0  ;;  %v570_v31 = vpop.f32.mrb[7].mxu1 }
 0x20a   :  { %v740_v32 = vpack.c.bf16 %v892_v28, %v530_v30  ;;  %v760_v33 = vpack.c.bf16 %v904_v29, %v570_v31 }
 0x20c   :  { %764 = vst [vmem:[%s1170_s6 + $0x18] sm:$0xff] %v740_v32   ;;  %768 = vst [vmem:[%s1170_s6 + $0x38] sm:$0xff] %v760_v33  }

// kernel: gcn2layer_sparse_forward.5
= control target key start
LH: loop header
LB: loop body
LE: loop exit
PB: predicated region body
PF: predicated region fallthrough
CT: control target
= control target key end

     0   :  { %v1097_v0 = vmov 0.0   ;;  %s1423_s0 = inlined_call_operand.<no memory space> [shape: s32[1,1], index: 0, kind: input, shape index: {}]   ;;  %s1424_s1 = inlined_call_operand.<no memory space> [shape: s32[1,1], index: 1, kind: input, shape index: {}]   ;;  %s1425_s3 = inlined_call_operand.vmem [shape: bf16[128,128], index: 3, kind: input, shape index: {}]   ;;  %s1426_s4 = inlined_call_operand.vmem [shape: f32[1,128], index: 4, kind: input, shape index: {}]   ;;  %s1427_s5 = inlined_call_operand.vmem [shape: f32[128,128], index: 5, kind: input, shape index: {}]   ;;  %s1428_s6 = inlined_call_operand.vmem [shape: f32[1,128], index: 6, kind: input, shape index: {}]   ;;  %s1429_s7 = inlined_call_operand.vmem [shape: f32[128,128], index: 7, kind: output, shape index: {}]   ;;  %s1430_s2 = inlined_call_operand.vmem [shape: bf16[128,128], index: 2, kind: input, shape index: {}]  }
   0x1   :  { %p48_p0 = scmp.lt.s32.totalorder %s1424_s1, 0  ;;  %61 = vst [vmem:[#allocation2] sm:$0xff] %v1097_v0  ;;  %62 = vst [vmem:[#allocation2 + $0x8] sm:$0xff] %v1097_v0  ;;  %p797_p1 = scmp.le.s32.totalorder %s1423_s0, 0 }
   0x2   :  { %63 = vst [vmem:[#allocation2 + $0x10] sm:$0xff] %v1097_v0  ;;  %64 = vst [vmem:[#allocation2 + $0x18] sm:$0xff] %v1097_v0  ;;  %v1017_v1 = vld [vmem:[%s1425_s3] sm:$0xff] (!%p797_p1)   ;;  %v1018_v2 = vld [vmem:[%s1425_s3 + $0x8] sm:$0xff] (!%p797_p1)  }
   0x3   :  { %65 = vst [vmem:[#allocation2 + $0x20] sm:$0xff] %v1097_v0  ;;  %66 = vst [vmem:[#allocation2 + $0x28] sm:$0xff] %v1097_v0  ;;  %s1432_s1 = smov (!%p48_p0, %s1424_s1), 0  ;;  %84 = sbr.rel (%p797_p1) target bundleno = 262 (0x106), region = 29 }
   0x4   :  { %67 = vst [vmem:[#allocation2 + $0x30] sm:$0xff] %v1097_v0  ;;  %68 = vst [vmem:[#allocation2 + $0x38] sm:$0xff] %v1097_v0  ;;  %s796_s30 = sshll.u32 %s1432_s1, 2  ;;  %864 = vmatprep.subr.bf16.mxu0 (!%p797_p1), %v1017_v1  ;;  %984 = vmatprep.subr.bf16.mxu1 (!%p797_p1), %v1017_v1  ;;  %v1019_v3 = vld [vmem:[%s1425_s3 + $0x10] sm:$0xff] (!%p797_p1)   ;;  %v1020_v4 = vld [vmem:[%s1425_s3 + $0x18] sm:$0xff] (!%p797_p1)  }
   0x5   :  { %69 = vst [vmem:[#allocation2 + $0x40] sm:$0xff] %v1097_v0  ;;  %70 = vst [vmem:[#allocation2 + $0x48] sm:$0xff] %v1097_v0  ;;  %s1151_s10 = scalar_lea.vmem %s1430_s2, %s796_s30  ;;  %865 = vmatpush3.bf16.msra.mxu0 (!%p797_p1), %v1017_v1  ;;  %992 = vmatpush3.bf16.msra.mxu1 (!%p797_p1), %v1017_v1  ;;  %v1021_v7 = vld [vmem:[%s1425_s3 + $0x20] sm:$0xff] (!%p797_p1)   ;;  %v1022_v8 = vld [vmem:[%s1425_s3 + $0x28] sm:$0xff] (!%p797_p1)  }
   0x6   :  { %71 = vst [vmem:[#allocation2 + $0x50] sm:$0xff] %v1097_v0  ;;  %72 = vst [vmem:[#allocation2 + $0x58] sm:$0xff] %v1097_v0  ;;  %866 = vmatprep.subr.bf16.mxu0 (!%p797_p1), %v1018_v2  ;;  %985 = vmatprep.subr.bf16.mxu1 (!%p797_p1), %v1018_v2  ;;  %v1025_v5 = vld [vmem:[%s1151_s10] sm:$0xff] (!%p797_p1)   ;;  %v1023_v9 = vld [vmem:[%s1425_s3 + $0x30] sm:$0xff] (!%p797_p1)  }
   0x7   :  { %73 = vst [vmem:[#allocation2 + $0x60] sm:$0xff] %v1097_v0  ;;  %74 = vst [vmem:[#allocation2 + $0x68] sm:$0xff] %v1097_v0  ;;  %v1026_v6 = vld [vmem:[%s1151_s10 + $0x20] sm:$0xff] (!%p797_p1)   ;;  %880 = vmatprep.mubr.bf16.mxu0 (!%p797_p1), %v1025_v5  ;;  %v1024_v10 = vld [vmem:[%s1425_s3 + $0x38] sm:$0xff] (!%p797_p1)  }
   0x8   :  { %75 = vst [vmem:[#allocation2 + $0x70] sm:$0xff] %v1097_v0  ;;  %76 = vst [vmem:[#allocation2 + $0x78] sm:$0xff] %v1097_v0  ;;  %888 = vmatprep.mubr.bf16.mxu1 (!%p797_p1), %v1026_v6  ;;  %v1027_v11 = vld [vmem:[%s1151_s10 + $0x8] sm:$0xff] (!%p797_p1)   ;;  %v1029_v13 = vld [vmem:[%s1151_s10 + $0x10] sm:$0xff] (!%p797_p1)  }
   0x9   :  { %867 = vmatpush3.bf16.msra.mxu0 (!%p797_p1), %v1018_v2  ;;  %993 = vmatpush3.bf16.msra.mxu1 (!%p797_p1), %v1018_v2  ;;  %v1028_v12 = vld [vmem:[%s1151_s10 + $0x28] sm:$0xff] (!%p797_p1)   ;;  %v1030_v14 = vld [vmem:[%s1151_s10 + $0x30] sm:$0xff] (!%p797_p1)   ;;  %v1031_v15 = vld [vmem:[%s1151_s10 + $0x18] sm:$0xff] (!%p797_p1)  }
   0xa   :  { %868 = vmatprep.subr.bf16.mxu0 %v1019_v3  ;;  %986 = vmatprep.subr.bf16.mxu1 %v1019_v3  ;;  %v1032_v16 = vld [vmem:[%s1151_s10 + $0x38] sm:$0xff]   ;;  %v108_v17 = vld [vmem:[#allocation2 + $0x10] sm:$0xff]  ;;  %v106_v19 = vld [vmem:[#allocation2] sm:$0xff] }
   0xb   :  { %v109_v23 = vld [vmem:[#allocation2 + $0x18] sm:$0xff]  ;;  %v107_v29 = vld [vmem:[#allocation2 + $0x8] sm:$0xff]  ;;  %v112_v41 = vld [vmem:[#allocation2 + $0x30] sm:$0xff] }
   0xc   :  { %v114_v20 = vld [vmem:[#allocation2 + $0x40] sm:$0xff]  ;;  %v115_v30 = vld [vmem:[#allocation2 + $0x48] sm:$0xff]  ;;  %v113_v47 = vld [vmem:[#allocation2 + $0x38] sm:$0xff] }
   0xd   :  { %869 = vmatpush3.bf16.msra.mxu0 %v1019_v3  ;;  %994 = vmatpush3.bf16.msra.mxu1 %v1019_v3  ;;  %v116_v18 = vld [vmem:[#allocation2 + $0x50] sm:$0xff]  ;;  %v117_v24 = vld [vmem:[#allocation2 + $0x58] sm:$0xff]  ;;  %v110_v43 = vld [vmem:[#allocation2 + $0x20] sm:$0xff] }
   0xe   :  { %870 = vmatprep.subr.bf16.mxu0 %v1020_v4  ;;  %987 = vmatprep.subr.bf16.mxu1 %v1020_v4  ;;  %v118_v44 = vld [vmem:[#allocation2 + $0x60] sm:$0xff]  ;;  %v111_v53 = vld [vmem:[#allocation2 + $0x28] sm:$0xff] }
   0xf   :  { %v120_v42 = vld [vmem:[#allocation2 + $0x70] sm:$0xff]  ;;  %v121_v48 = vld [vmem:[#allocation2 + $0x78] sm:$0xff]  ;;  %v119_v54 = vld [vmem:[#allocation2 + $0x68] sm:$0xff] }
  0x11   :  { %871 = vmatpush3.bf16.msra.mxu0 %v1020_v4  ;;  %995 = vmatpush3.bf16.msra.mxu1 %v1020_v4 }
  0x12   :  { %872 = vmatprep.subr.bf16.mxu0 %v1021_v7  ;;  %988 = vmatprep.subr.bf16.mxu1 %v1021_v7 }
  0x15   :  { %873 = vmatpush3.bf16.msra.mxu0 %v1021_v7  ;;  %996 = vmatpush3.bf16.msra.mxu1 %v1021_v7 }
  0x16   :  { %874 = vmatprep.subr.bf16.mxu0 %v1022_v8  ;;  %989 = vmatprep.subr.bf16.mxu1 %v1022_v8 }
  0x19   :  { %875 = vmatpush3.bf16.msra.mxu0 %v1022_v8  ;;  %997 = vmatpush3.bf16.msra.mxu1 %v1022_v8 }
  0x1a   :  { %876 = vmatprep.subr.bf16.mxu0 %v1023_v9  ;;  %990 = vmatprep.subr.bf16.mxu1 %v1023_v9 }
  0x1d   :  { %877 = vmatpush3.bf16.msra.mxu0 %v1023_v9  ;;  %998 = vmatpush3.bf16.msra.mxu1 %v1023_v9 }
  0x1e   :  { %878 = vmatprep.subr.bf16.mxu0 %v1024_v10  ;;  %991 = vmatprep.subr.bf16.mxu1 %v1024_v10 }
  0x21   :  { %879 = vmatpush3.bf16.msra.mxu0 %v1024_v10  ;;  %999 = vmatpush3.bf16.msra.mxu1 %v1024_v10 }
  0x24   :  { %881 = vmatmul.mubr.bf16.vlgmr.msra.gmra.mrb[0].mxu0 %v1027_v11  ;;  %889 = vmatmul.mubr.bf16.vlgmr.msra.gmra.mrb[0].mxu1 %v1028_v12 }
  0x25   :  { %884 = vmatprep.mubr.bf16.mxu0 %v1029_v13  ;;  %892 = vmatprep.mubr.bf16.mxu1 %v1030_v14 }
  0x2c   :  { %885 = vmatmul.mubr.bf16.gmra.mrb[4].mxu0 %v1031_v15  ;;  %893 = vmatmul.mubr.bf16.gmra.mrb[4].mxu1 %v1032_v16 }
  0xf7   :  { %v882_v21 = vpop.f32.mrb[0].mxu0  ;;  %v890_v22 = vpop.f32.mrb[0].mxu1 }
  0xf8   :  { %v333_v25 = vadd.f32 %v882_v21, %v108_v17  ;;  %v341_v26 = vadd.f32 %v890_v22, %v116_v18  ;;  %v268_v27 = vpop.f32.mrb[1].mxu0  ;;  %v300_v28 = vpop.f32.mrb[1].mxu1 }
  0xf9   :  { %v331_v31 = vadd.f32 %v268_v27, %v106_v19  ;;  %v339_v32 = vadd.f32 %v300_v28, %v114_v20  ;;  %v883_v33 = vpop.f32.mrb[2].mxu0  ;;  %v891_v34 = vpop.f32.mrb[2].mxu1 }
  0xfa   :  { %349 = vst [vmem:[#allocation2 + $0x10] sm:$0xff] %v333_v25  ;;  %357 = vst [vmem:[#allocation2 + $0x50] sm:$0xff] %v341_v26  ;;  %v334_v35 = vadd.f32 %v883_v33, %v109_v23  ;;  %v342_v36 = vadd.f32 %v891_v34, %v117_v24  ;;  %v271_v37 = vpop.f32.mrb[3].mxu0  ;;  %v303_v38 = vpop.f32.mrb[3].mxu1 }
  0xfb   :  { %347 = vst [vmem:[#allocation2] sm:$0xff] %v331_v31  ;;  %355 = vst [vmem:[#allocation2 + $0x40] sm:$0xff] %v339_v32  ;;  %v332_v39 = vadd.f32 %v271_v37, %v107_v29  ;;  %v340_v40 = vadd.f32 %v303_v38, %v115_v30 }
  0xfc   :  { %350 = vst [vmem:[#allocation2 + $0x18] sm:$0xff] %v334_v35  ;;  %358 = vst [vmem:[#allocation2 + $0x58] sm:$0xff] %v342_v36 }
  0xfd   :  { %348 = vst [vmem:[#allocation2 + $0x8] sm:$0xff] %v332_v39  ;;  %356 = vst [vmem:[#allocation2 + $0x48] sm:$0xff] %v340_v40 }
  0xff   :  { %v886_v45 = vpop.f32.mrb[4].mxu0  ;;  %v894_v46 = vpop.f32.mrb[4].mxu1 }
 0x100   :  { %v337_v49 = vadd.f32 %v886_v45, %v112_v41  ;;  %v345_v50 = vadd.f32 %v894_v46, %v120_v42  ;;  %v284_v51 = vpop.f32.mrb[5].mxu0  ;;  %v316_v52 = vpop.f32.mrb[5].mxu1 }
 0x101   :  { %v335_v55 = vadd.f32 %v284_v51, %v110_v43  ;;  %v343_v56 = vadd.f32 %v316_v52, %v118_v44  ;;  %v887_v57 = vpop.f32.mrb[6].mxu0  ;;  %v895_v58 = vpop.f32.mrb[6].mxu1 }
 0x102   :  { %353 = vst [vmem:[#allocation2 + $0x30] sm:$0xff] %v337_v49  ;;  %361 = vst [vmem:[#allocation2 + $0x70] sm:$0xff] %v345_v50  ;;  %v338_v59 = vadd.f32 %v887_v57, %v113_v47  ;;  %v346_v60 = vadd.f32 %v895_v58, %v121_v48  ;;  %v287_v61 = vpop.f32.mrb[7].mxu0  ;;  %v319_v62 = vpop.f32.mrb[7].mxu1 }
 0x103   :  { %351 = vst [vmem:[#allocation2 + $0x20] sm:$0xff] %v335_v55  ;;  %359 = vst [vmem:[#allocation2 + $0x60] sm:$0xff] %v343_v56  ;;  %v336_v63 = vadd.f32 %v287_v61, %v111_v53  ;;  %v344_v0 = vadd.f32 %v319_v62, %v119_v54 }
 0x104   :  { %354 = vst [vmem:[#allocation2 + $0x38] sm:$0xff] %v338_v59  ;;  %362 = vst [vmem:[#allocation2 + $0x78] sm:$0xff] %v346_v60 }
 0x105   :  { %352 = vst [vmem:[#allocation2 + $0x28] sm:$0xff] %v336_v63  ;;  %360 = vst [vmem:[#allocation2 + $0x68] sm:$0xff] %v344_v0 }
 0x106 PF:  { %v421_v1 = vld [vmem:[%s1427_s5] sm:$0xff]  ;;  %v422_v2 = vld [vmem:[%s1427_s5 + $0x8] sm:$0xff]  ;;  %v423_v3 = vld [vmem:[%s1427_s5 + $0x10] sm:$0xff] }
 0x107   :  { %v952_v4 = vpack.c.bf16 %v422_v2, %v421_v1  ;;  %v424_v5 = vld [vmem:[%s1427_s5 + $0x18] sm:$0xff]  ;;  %v425_v7 = vld [vmem:[%s1427_s5 + $0x20] sm:$0xff]  ;;  %v426_v8 = vld [vmem:[%s1427_s5 + $0x28] sm:$0xff] }
 0x108   :  { %v956_v6 = vpack.c.bf16 %v424_v5, %v423_v3  ;;  %v960_v9 = vpack.c.bf16 %v426_v8, %v425_v7  ;;  %v366_v10 = vld [vmem:[#allocation2] sm:$0xff]  ;;  %v427_v12 = vld [vmem:[%s1427_s5 + $0x30] sm:$0xff]  ;;  %v428_v13 = vld [vmem:[%s1427_s5 + $0x38] sm:$0xff] }
 0x109   :  { %953 = vmatprep.subr.bf16.mxu0 %v952_v4  ;;  %1000 = vmatprep.subr.bf16.mxu1 %v952_v4  ;;  %v1209_v11 = vld [vmem:[%s1426_s4] ss:$0 sm:$0xff]  ;;  %v964_v18 = vpack.c.bf16 %v428_v13, %v427_v12  ;;  %v430_v21 = vld [vmem:[%s1427_s5 + $0x48] sm:$0xff]  ;;  %v431_v23 = vld [vmem:[%s1427_s5 + $0x50] sm:$0xff] }
 0x10a   :  { %955 = vmatpush3.bf16.msra.mxu0 %v952_v4  ;;  %1008 = vmatpush3.bf16.msra.mxu1 %v952_v4  ;;  %v389_v14 = vadd.f32 %v1209_v11, %v366_v10  ;;  %v374_v15 = vld [vmem:[#allocation2 + $0x40] sm:$0xff]  ;;  %v432_v24 = vld [vmem:[%s1427_s5 + $0x58] sm:$0xff]  ;;  %v434_v27 = vld [vmem:[%s1427_s5 + $0x68] sm:$0xff]  ;;  %v589_v10 = vlaneseq }
 0x10b   :  { %957 = vmatprep.subr.bf16.mxu0 %v956_v6  ;;  %1001 = vmatprep.subr.bf16.mxu1 %v956_v6  ;;  %v397_v16 = vadd.f32 %v1209_v11, %v374_v15  ;;  %v429_v20 = vld [vmem:[%s1427_s5 + $0x40] sm:$0xff]  ;;  %v972_v25 = vpack.c.bf16 %v432_v24, %v431_v23  ;;  %v435_v29 = vld [vmem:[%s1427_s5 + $0x70] sm:$0xff]  ;;  %v436_v30 = vld [vmem:[%s1427_s5 + $0x78] sm:$0xff] }
 0x10c   :  { %v405_v17 = vmax.f32 %v389_v14, 0.0  ;;  %v968_v22 = vpack.c.bf16 %v430_v21, %v429_v20  ;;  %v433_v26 = vld [vmem:[%s1427_s5 + $0x60] sm:$0xff]  ;;  %v367_v31 = vld [vmem:[#allocation2 + $0x8] sm:$0xff]  ;;  %v980_v33 = vpack.c.bf16 %v436_v30, %v435_v29  ;;  %v368_v34 = vld [vmem:[#allocation2 + $0x10] sm:$0xff]  ;;  %v1257_v12 = vand.u32 127, %v589_v10 }
 0x10d   :  { %v413_v19 = vmax.f32 %v397_v16, 0.0  ;;  %v976_v28 = vpack.c.bf16 %v434_v27, %v433_v26  ;;  %v375_v32 = vld [vmem:[#allocation2 + $0x48] sm:$0xff]  ;;  %v376_v35 = vld [vmem:[#allocation2 + $0x50] sm:$0xff]  ;;  %v390_v36 = vadd.f32 %v1209_v11, %v367_v31  ;;  %v391_v38 = vadd.f32 %v1209_v11, %v368_v34  ;;  %v369_v39 = vld [vmem:[#allocation2 + $0x18] sm:$0xff] }
 0x10e   :  { %959 = vmatpush3.bf16.msra.mxu0 %v956_v6  ;;  %1009 = vmatpush3.bf16.msra.mxu1 %v956_v6  ;;  %v398_v37 = vadd.f32 %v1209_v11, %v375_v32  ;;  %v399_v40 = vadd.f32 %v1209_v11, %v376_v35  ;;  %v377_v41 = vld [vmem:[#allocation2 + $0x58] sm:$0xff]  ;;  %v370_v42 = vld [vmem:[#allocation2 + $0x20] sm:$0xff]  ;;  %v392_v46 = vadd.f32 %v1209_v11, %v369_v39  ;;  %v371_v51 = vld [vmem:[#allocation2 + $0x28] sm:$0xff]  ;;  %vm591_vm0 = vcmp.lt.s32.totalorder %v1257_v12, 4 }
 0x10f   :  { %961 = vmatprep.subr.bf16.mxu0 %v960_v9  ;;  %1002 = vmatprep.subr.bf16.mxu1 %v960_v9  ;;  %v378_v43 = vld [vmem:[#allocation2 + $0x60] sm:$0xff]  ;;  %v406_v44 = vmax.f32 %v390_v36, 0.0  ;;  %v400_v47 = vadd.f32 %v1209_v11, %v377_v41  ;;  %v407_v48 = vmax.f32 %v391_v38, 0.0  ;;  %v393_v50 = vadd.f32 %v1209_v11, %v370_v42  ;;  %v379_v53 = vld [vmem:[#allocation2 + $0x68] sm:$0xff]  ;;  %v372_v54 = vld [vmem:[#allocation2 + $0x30] sm:$0xff] }
 0x110   :  { %928 = vmatprep.mubr.f32.mxu0 %v405_v17  ;;  %940 = vmatprep.mubr.f32.mxu1 %v413_v19  ;;  %v414_v45 = vmax.f32 %v398_v37, 0.0  ;;  %v415_v49 = vmax.f32 %v399_v40, 0.0  ;;  %v401_v52 = vadd.f32 %v1209_v11, %v378_v43  ;;  %v380_v55 = vld [vmem:[#allocation2 + $0x70] sm:$0xff]  ;;  %v408_v56 = vmax.f32 %v392_v46, 0.0  ;;  %v373_v63 = vld [vmem:[#allocation2 + $0x38] sm:$0xff] }
 0x111   :  { %v416_v57 = vmax.f32 %v400_v47, 0.0  ;;  %v394_v58 = vadd.f32 %v1209_v11, %v371_v51  ;;  %v402_v59 = vadd.f32 %v1209_v11, %v379_v53  ;;  %v409_v60 = vmax.f32 %v393_v50, 0.0  ;;  %v381_v1 = vld [vmem:[#allocation2 + $0x78] sm:$0xff]  ;;  %v815_v13 = vld [vmem:[%s1428_s6] ss:$0 sm:$0xff] }
 0x112   :  { %963 = vmatpush3.bf16.msra.mxu0 %v960_v9  ;;  %1010 = vmatpush3.bf16.msra.mxu1 %v960_v9  ;;  %v417_v61 = vmax.f32 %v401_v52, 0.0  ;;  %v395_v62 = vadd.f32 %v1209_v11, %v372_v54  ;;  %v403_v0 = vadd.f32 %v1209_v11, %v380_v55  ;;  %v396_v4 = vadd.f32 %v1209_v11, %v373_v63 }
 0x113   :  { %965 = vmatprep.subr.bf16.mxu0 %v964_v18  ;;  %1003 = vmatprep.subr.bf16.mxu1 %v964_v18  ;;  %v410_v2 = vmax.f32 %v394_v58, 0.0  ;;  %v418_v3 = vmax.f32 %v402_v59, 0.0  ;;  %v404_v5 = vadd.f32 %v1209_v11, %v381_v1 }
 0x114   :  { %v411_v6 = vmax.f32 %v395_v62, 0.0  ;;  %v419_v7 = vmax.f32 %v403_v0, 0.0  ;;  %v412_v8 = vmax.f32 %v396_v4, 0.0 }
 0x115   :  { %v420_v9 = vmax.f32 %v404_v5, 0.0 }
 0x116   :  { %967 = vmatpush3.bf16.msra.mxu0 %v964_v18  ;;  %1011 = vmatpush3.bf16.msra.mxu1 %v964_v18 }
 0x117   :  { %969 = vmatprep.subr.bf16.mxu0 %v968_v22  ;;  %1004 = vmatprep.subr.bf16.mxu1 %v968_v22 }
 0x11a   :  { %971 = vmatpush3.bf16.msra.mxu0 %v968_v22  ;;  %1012 = vmatpush3.bf16.msra.mxu1 %v968_v22 }
 0x11b   :  { %973 = vmatprep.subr.bf16.mxu0 %v972_v25  ;;  %1005 = vmatprep.subr.bf16.mxu1 %v972_v25 }
 0x11e   :  { %975 = vmatpush3.bf16.msra.mxu0 %v972_v25  ;;  %1013 = vmatpush3.bf16.msra.mxu1 %v972_v25 }
 0x11f   :  { %977 = vmatprep.subr.bf16.mxu0 %v976_v28  ;;  %1006 = vmatprep.subr.bf16.mxu1 %v976_v28 }
 0x122   :  { %979 = vmatpush3.bf16.msra.mxu0 %v976_v28  ;;  %1014 = vmatpush3.bf16.msra.mxu1 %v976_v28 }
 0x123   :  { %981 = vmatprep.subr.bf16.mxu0 %v980_v33  ;;  %1007 = vmatprep.subr.bf16.mxu1 %v980_v33 }
 0x126   :  { %983 = vmatpush3.bf16.msra.mxu0 %v980_v33  ;;  %1015 = vmatpush3.bf16.msra.mxu1 %v980_v33 }
 0x129   :  { %929 = vmatmul.mubr.f32.vlgmr.msra.gmra.mrb[0].mxu0 %v406_v44  ;;  %941 = vmatmul.mubr.f32.vlgmr.msra.gmra.mrb[0].mxu1 %v414_v45 }
 0x12a   :  { %931 = vmatprep.mubr.f32.mxu0 %v407_v48  ;;  %943 = vmatprep.mubr.f32.mxu1 %v415_v49 }
 0x12d   :  { %932 = vmatmul.mubr.f32.gmra.mrb[2].mxu0 %v408_v56  ;;  %944 = vmatmul.mubr.f32.gmra.mrb[2].mxu1 %v416_v57 }
 0x12e   :  { %934 = vmatprep.mubr.f32.mxu0 %v409_v60  ;;  %946 = vmatprep.mubr.f32.mxu1 %v417_v61 }
 0x131   :  { %935 = vmatmul.mubr.f32.gmra.mrb[4].mxu0 %v410_v2  ;;  %947 = vmatmul.mubr.f32.gmra.mrb[4].mxu1 %v418_v3 }
 0x132   :  { %937 = vmatprep.mubr.f32.mxu0 %v411_v6  ;;  %949 = vmatprep.mubr.f32.mxu1 %v419_v7 }
 0x135   :  { %938 = vmatmul.mubr.f32.gmra.mrb[6].mxu0 %v412_v8  ;;  %950 = vmatmul.mubr.f32.gmra.mrb[6].mxu1 %v420_v9 }
 0x1fc   :  { %v930_v11 = vpop.f32.mrb[0].mxu0  ;;  %v942_v14 = vpop.f32.mrb[0].mxu1 }
 0x1fd   :  { %v516_v15 = vadd.f32 %v930_v11, %v815_v13  ;;  %v556_v16 = vadd.f32 %v942_v14, %v815_v13  ;;  %v510_v17 = vpop.f32.mrb[1].mxu0  ;;  %v550_v18 = vpop.f32.mrb[1].mxu1 }
 0x1fe   :  { %v511_v19 = vadd.f32 %v815_v13, %v510_v17  ;;  %v551_v28 = vadd.f32 %v815_v13, %v550_v18 }
 0x1ff   :  { %v601_v20 = vsel %vm591_vm0, %v556_v16, -inf  ;;  %v593_v21 = vsel %vm591_vm0, %v516_v15, -inf }
 0x200   :  { %626 = vmax.xlane.f32.xlu1 %v601_v20  ;;  %610 = vmax.xlane.f32.xlu0 %v593_v21  ;;  %v933_v22 = vpop.f32.mrb[2].mxu0  ;;  %v945_v23 = vpop.f32.mrb[2].mxu1  ;;  %v592_v30 = vsel %vm591_vm0, %v511_v19, -inf  ;;  %v600_v38 = vsel %vm591_vm0, %v551_v28, -inf }
 0x201   :  { %v526_v24 = vadd.f32 %v933_v22, %v815_v13  ;;  %v520_v25 = vpop.f32.mrb[3].mxu0  ;;  %v566_v26 = vadd.f32 %v945_v23, %v815_v13  ;;  %v560_v27 = vpop.f32.mrb[3].mxu1 }
 0x202   :  { %v521_v36 = vadd.f32 %v815_v13, %v520_v25  ;;  %v561_v37 = vadd.f32 %v815_v13, %v560_v27 }
 0x203   :  { %v595_v29 = vsel %vm591_vm0, %v526_v24, -inf  ;;  %v603_v33 = vsel %vm591_vm0, %v566_v26, -inf }
 0x204   :  { %614 = vmax.xlane.f32.xlu1 %v595_v29  ;;  %608 = vmax.xlane.f32.xlu0 %v592_v30  ;;  %v936_v31 = vpop.f32.mrb[4].mxu0  ;;  %v948_v32 = vpop.f32.mrb[4].mxu1  ;;  %v594_v45 = vsel %vm591_vm0, %v521_v36, -inf  ;;  %v602_v46 = vsel %vm591_vm0, %v561_v37, -inf }
 0x205   :  { %v530_v34 = vpop.f32.mrb[5].mxu0  ;;  %v570_v35 = vpop.f32.mrb[5].mxu1  ;;  %v536_v41 = vadd.f32 %v936_v31, %v815_v13  ;;  %v576_v47 = vadd.f32 %v948_v32, %v815_v13 }
 0x206   :  { %v531_v42 = vadd.f32 %v815_v13, %v530_v34  ;;  %v571_v48 = vadd.f32 %v815_v13, %v570_v35 }
 0x207   :  { %v597_v49 = vsel %vm591_vm0, %v536_v41, -inf  ;;  %v605_v53 = vsel %vm591_vm0, %v576_v47, -inf }
 0x208   :  { %630 = vmax.xlane.f32.xlu1 %v603_v33  ;;  %624 = vmax.xlane.f32.xlu0 %v600_v38  ;;  %v939_v39 = vpop.f32.mrb[6].mxu0  ;;  %v951_v40 = vpop.f32.mrb[6].mxu1  ;;  %v596_v50 = vsel %vm591_vm0, %v531_v42, -inf  ;;  %v604_v54 = vsel %vm591_vm0, %v571_v48, -inf }
 0x209   :  { %v540_v43 = vpop.f32.mrb[7].mxu0  ;;  %v580_v44 = vpop.f32.mrb[7].mxu1  ;;  %v546_v51 = vadd.f32 %v939_v39, %v815_v13  ;;  %v586_v55 = vadd.f32 %v951_v40, %v815_v13 }
 0x20a   :  { %v541_v52 = vadd.f32 %v815_v13, %v540_v43  ;;  %v581_v56 = vadd.f32 %v815_v13, %v580_v44 }
 0x20b   :  { %v1289_v57 = vsel %vm591_vm0, %v546_v51, -inf  ;;  %v1299_v59 = vsel %vm591_vm0, %v586_v55, -inf }
 0x20c   :  { %612 = vmax.xlane.f32.xlu1 %v594_v45  ;;  %628 = vmax.xlane.f32.xlu0 %v602_v46  ;;  %v1293_v58 = vsel %vm591_vm0, %v541_v52, -inf  ;;  %v1303_v60 = vsel %vm591_vm0, %v581_v56, -inf }
 0x210   :  { %618 = vmax.xlane.f32.xlu1 %v597_v49  ;;  %616 = vmax.xlane.f32.xlu0 %v596_v50 }
 0x214   :  { %634 = vmax.xlane.f32.xlu1 %v605_v53  ;;  %632 = vmax.xlane.f32.xlu0 %v604_v54 }
 0x218   :  { %622 = vmax.xlane.f32.xlu1 %v1289_v57  ;;  %620 = vmax.xlane.f32.xlu0 %v1293_v58 }
 0x21c   :  { %638 = vmax.xlane.f32.xlu1 %v1299_v59  ;;  %636 = vmax.xlane.f32.xlu0 %v1303_v60 }
 0x28d   :  { %v627_v61 = vpop.xlane.xlu1 %626  ;;  %v611_v62 = vpop.xlane.xlu0 %610 }
 0x28e   :  { %v1307_v63 = vsub.f32 %v601_v20, %v627_v61  ;;  %v1309_v0 = vsub.f32 %v593_v21, %v611_v62 }
 0x290   :  { %v658_v1 = vmul.f32 1.442695, %v1309_v0  ;;  %v674_v4 = vmul.f32 1.442695, %v1307_v63 }
 0x291   :  { %v615_v2 = vpop.xlane.xlu1 %614  ;;  %v609_v3 = vpop.xlane.xlu0 %608 }
 0x292   :  { %v1313_v5 = vsub.f32 %v595_v29, %v615_v2  ;;  %v1315_v6 = vsub.f32 %v592_v30, %v609_v3  ;;  %1033 = vpow2.f32 %v658_v1 }
 0x293   :  { %1035 = vpow2.f32 %v674_v4 }
 0x294   :  { %v656_v7 = vmul.f32 1.442695, %v1315_v6  ;;  %v662_v10 = vmul.f32 1.442695, %v1313_v5 }
 0x295   :  { %v631_v8 = vpop.xlane.xlu1 %630  ;;  %v625_v9 = vpop.xlane.xlu0 %624 }
 0x296   :  { %v1319_v12 = vsub.f32 %v600_v38, %v625_v9  ;;  %1037 = vpow2.f32 %v656_v7  ;;  %v1321_v13 = vsub.f32 %v603_v33, %v631_v8 }
 0x297   :  { %1039 = vpow2.f32 %v662_v10 }
 0x298   :  { %v672_v11 = vmul.f32 1.442695, %v1319_v12  ;;  %v678_v17 = vmul.f32 1.442695, %v1321_v13 }
 0x299   :  { %v613_v14 = vpop.xlane.xlu1 %612  ;;  %v629_v15 = vpop.xlane.xlu0 %628 }
 0x29a   :  { %v1324_v16 = vsub.f32 %v594_v45, %v613_v14  ;;  %1041 = vpow2.f32 %v672_v11  ;;  %v1327_v18 = vsub.f32 %v602_v46, %v629_v15 }
 0x29c   :  { %v660_v19 = vmul.f32 1.442695, %v1324_v16  ;;  %v1034_v20 = vpop.eup %1033  ;;  %v676_v24 = vmul.f32 1.442695, %v1327_v18 }
 0x29d   :  { %v619_v21 = vpop.xlane.xlu1 %618  ;;  %v617_v22 = vpop.xlane.xlu0 %616  ;;  %690 = vadd.xlane.f32.xlu1 %v1034_v20 }
 0x29e   :  { %1043 = vpow2.f32 %v660_v19  ;;  %v1330_v23 = vsub.f32 %v597_v49, %v619_v21  ;;  %v1333_v25 = vsub.f32 %v596_v50, %v617_v22  ;;  %v1036_v26 = vpop.eup %1035 }
 0x29f   :  { %1045 = vpow2.f32 %v678_v17 }
 0x2a0   :  { %v666_v27 = vmul.f32 1.442695, %v1330_v23  ;;  %v1038_v28 = vpop.eup %1037  ;;  %v664_v32 = vmul.f32 1.442695, %v1333_v25 }
 0x2a1   :  { %v635_v29 = vpop.xlane.xlu1 %634  ;;  %v633_v30 = vpop.xlane.xlu0 %632  ;;  %706 = vadd.xlane.f32.xlu1 %v1036_v26  ;;  %688 = vadd.xlane.f32.xlu0 %v1038_v28 }
 0x2a2   :  { %1047 = vpow2.f32 %v666_v27  ;;  %v1336_v31 = vsub.f32 %v605_v53, %v635_v29  ;;  %v1339_v33 = vsub.f32 %v604_v54, %v633_v30  ;;  %v1040_v34 = vpop.eup %1039 }
 0x2a3   :  { %1049 = vpow2.f32 %v676_v24 }
 0x2a4   :  { %v682_v35 = vmul.f32 1.442695, %v1336_v31  ;;  %v1042_v36 = vpop.eup %1041  ;;  %v680_v40 = vmul.f32 1.442695, %v1339_v33 }
 0x2a5   :  { %v623_v37 = vpop.xlane.xlu1 %622  ;;  %v621_v38 = vpop.xlane.xlu0 %620  ;;  %694 = vadd.xlane.f32.xlu1 %v1040_v34  ;;  %704 = vadd.xlane.f32.xlu0 %v1042_v36 }
 0x2a6   :  { %1051 = vpow2.f32 %v682_v35  ;;  %v1343_v39 = vsub.f32 %v1289_v57, %v623_v37  ;;  %v1347_v41 = vsub.f32 %v1293_v58, %v621_v38 }
 0x2a7   :  { %1053 = vpow2.f32 %v664_v32 }
 0x2a8   :  { %v1044_v42 = vpop.eup %1043  ;;  %v670_v43 = vmul.f32 1.442695, %v1343_v39  ;;  %v668_v48 = vmul.f32 1.442695, %v1347_v41 }
 0x2a9   :  { %v1046_v44 = vpop.eup %1045  ;;  %v639_v45 = vpop.xlane.xlu1 %638  ;;  %692 = vadd.xlane.f32.xlu0 %v1044_v42 }
 0x2aa   :  { %v637_v46 = vpop.xlane.xlu0 %636  ;;  %1055 = vpow2.f32 %v670_v43  ;;  %710 = vadd.xlane.f32.xlu1 %v1046_v44  ;;  %v1351_v47 = vsub.f32 %v1299_v59, %v639_v45 }
 0x2ab   :  { %1057 = vpow2.f32 %v680_v40  ;;  %v1355_v49 = vsub.f32 %v1303_v60, %v637_v46 }
 0x2ac   :  { %v1048_v50 = vpop.eup %1047  ;;  %v686_v51 = vmul.f32 1.442695, %v1351_v47 }
 0x2ad   :  { %v1050_v52 = vpop.eup %1049  ;;  %v684_v53 = vmul.f32 1.442695, %v1355_v49 }
 0x2ae   :  { %1059 = vpow2.f32 %v686_v51  ;;  %698 = vadd.xlane.f32.xlu1 %v1048_v50  ;;  %708 = vadd.xlane.f32.xlu0 %v1050_v52 }
 0x2af   :  { %1061 = vpow2.f32 %v668_v48 }
 0x2b0   :  { %v1052_v54 = vpop.eup %1051  ;;  %1063 = vpow2.f32 %v684_v53 }
 0x2b1   :  { %v1054_v55 = vpop.eup %1053 }
 0x2b2   :  { %714 = vadd.xlane.f32.xlu1 %v1052_v54  ;;  %696 = vadd.xlane.f32.xlu0 %v1054_v55 }
 0x2b4   :  { %v1056_v56 = vpop.eup %1055 }
 0x2b5   :  { %v1058_v57 = vpop.eup %1057 }
 0x2b6   :  { %702 = vadd.xlane.f32.xlu1 %v1056_v56  ;;  %712 = vadd.xlane.f32.xlu0 %v1058_v57 }
 0x2b8   :  { %v1060_v58 = vpop.eup %1059 }
 0x2b9   :  { %v1062_v59 = vpop.eup %1061 }
 0x2ba   :  { %718 = vadd.xlane.f32.xlu1 %v1060_v58  ;;  %700 = vadd.xlane.f32.xlu0 %v1062_v59  ;;  %v1064_v60 = vpop.eup %1063 }
 0x2be   :  { %716 = vadd.xlane.f32.xlu0 %v1064_v60 }
 0x32a   :  { %v691_v61 = vpop.xlane.xlu1 %690 }
 0x32b   :  { %1065 = vlog2.f32 %v691_v61 }
 0x32e   :  { %v707_v62 = vpop.xlane.xlu1 %706  ;;  %v689_v1 = vpop.xlane.xlu0 %688 }
 0x32f   :  { %1067 = vlog2.f32 %v707_v62 }
 0x330   :  { %1069 = vlog2.f32 %v689_v1 }
 0x332   :  { %v695_v2 = vpop.xlane.xlu1 %694  ;;  %v705_v3 = vpop.xlane.xlu0 %704 }
 0x333   :  { %1071 = vlog2.f32 %v695_v2 }
 0x334   :  { %1073 = vlog2.f32 %v705_v3 }
 0x335   :  { %v1066_v4 = vpop.eup %1065 }
 0x336   :  { %v723_v7 = vmul.f32 0.6931472, %v1066_v4  ;;  %v693_v9 = vpop.xlane.xlu0 %692 }
 0x337   :  { %v711_v8 = vpop.xlane.xlu1 %710 }
 0x338   :  { %1075 = vlog2.f32 %v711_v8  ;;  %v753_v10 = vsub.f32 %v1309_v0, %v723_v7 }
 0x339   :  { %1077 = vlog2.f32 %v693_v9  ;;  %v1068_v11 = vpop.eup %1067 }
 0x33a   :  { %v1070_v14 = vpop.eup %1069  ;;  %769 = vst [vmem:[%s1429_s7 + $0x8] sm:$0xff] %v753_v10  ;;  %v739_v15 = vmul.f32 0.6931472, %v1068_v11 }
 0x33b   :  { %v699_v17 = vpop.xlane.xlu1 %698  ;;  %v709_v19 = vpop.xlane.xlu0 %708  ;;  %v721_v20 = vmul.f32 0.6931472, %v1070_v14 }
 0x33c   :  { %1079 = vlog2.f32 %v699_v17  ;;  %v761_v21 = vsub.f32 %v1307_v63, %v739_v15 }
 0x33d   :  { %1081 = vlog2.f32 %v709_v19  ;;  %v1072_v22 = vpop.eup %1071  ;;  %v752_v24 = vsub.f32 %v1315_v6, %v721_v20 }
 0x33e   :  { %v1074_v26 = vpop.eup %1073  ;;  %777 = vst [vmem:[%s1429_s7 + $0x48] sm:$0xff] %v761_v21  ;;  %v727_v0 = vmul.f32 0.6931472, %v1072_v22 }
 0x33f   :  { %v715_v27 = vpop.xlane.xlu1 %714  ;;  %v697_v28 = vpop.xlane.xlu0 %696  ;;  %768 = vst [vmem:[%s1429_s7] sm:$0xff] %v752_v24  ;;  %v737_v29 = vmul.f32 0.6931472, %v1074_v26 }
 0x340   :  { %1083 = vlog2.f32 %v715_v27  ;;  %v755_v63 = vsub.f32 %v1313_v5, %v727_v0 }
 0x341   :  { %1085 = vlog2.f32 %v697_v28  ;;  %v760_v6 = vsub.f32 %v1319_v12, %v737_v29 }
 0x342   :  { %v1076_v30 = vpop.eup %1075  ;;  %771 = vst [vmem:[%s1429_s7 + $0x18] sm:$0xff] %v755_v63 }
 0x343   :  { %v1078_v32 = vpop.eup %1077  ;;  %v743_v34 = vmul.f32 0.6931472, %v1076_v30  ;;  %v703_v35 = vpop.xlane.xlu1 %702  ;;  %776 = vst [vmem:[%s1429_s7 + $0x40] sm:$0xff] %v760_v6 }
 0x344   :  { %v713_v36 = vpop.xlane.xlu0 %712  ;;  %v725_v37 = vmul.f32 0.6931472, %v1078_v32  ;;  %1087 = vlog2.f32 %v703_v35 }
 0x345   :  { %v763_v5 = vsub.f32 %v1321_v13, %v743_v34  ;;  %1089 = vlog2.f32 %v713_v36 }
 0x346   :  { %v1080_v38 = vpop.eup %1079  ;;  %v754_v12 = vsub.f32 %v1324_v16, %v725_v37 }
 0x347   :  { %v1082_v40 = vpop.eup %1081  ;;  %779 = vst [vmem:[%s1429_s7 + $0x58] sm:$0xff] %v763_v5  ;;  %v731_v42 = vmul.f32 0.6931472, %v1080_v38  ;;  %v719_v43 = vpop.xlane.xlu1 %718 }
 0x348   :  { %v701_v44 = vpop.xlane.xlu0 %700  ;;  %770 = vst [vmem:[%s1429_s7 + $0x10] sm:$0xff] %v754_v12  ;;  %v741_v45 = vmul.f32 0.6931472, %v1082_v40  ;;  %1091 = vlog2.f32 %v719_v43 }
 0x349   :  { %v757_v13 = vsub.f32 %v1330_v23, %v731_v42  ;;  %1093 = vlog2.f32 %v701_v44 }
 0x34a   :  { %v1084_v46 = vpop.eup %1083  ;;  %v762_v16 = vsub.f32 %v1327_v18, %v741_v45 }
 0x34b   :  { %v1086_v48 = vpop.eup %1085  ;;  %773 = vst [vmem:[%s1429_s7 + $0x28] sm:$0xff] %v757_v13  ;;  %v747_v50 = vmul.f32 0.6931472, %v1084_v46 }
 0x34c   :  { %v717_v51 = vpop.xlane.xlu0 %716  ;;  %778 = vst [vmem:[%s1429_s7 + $0x50] sm:$0xff] %v762_v16  ;;  %v729_v52 = vmul.f32 0.6931472, %v1086_v48 }
 0x34d   :  { %1095 = vlog2.f32 %v717_v51  ;;  %v765_v53 = vsub.f32 %v1336_v31, %v747_v50 }
 0x34e   :  { %v1088_v23 = vpop.eup %1087  ;;  %v756_v54 = vsub.f32 %v1333_v25, %v729_v52 }
 0x34f   :  { %v1090_v55 = vpop.eup %1089  ;;  %781 = vst [vmem:[%s1429_s7 + $0x68] sm:$0xff] %v765_v53  ;;  %v735_v18 = vmul.f32 0.6931472, %v1088_v23 }
 0x350   :  { %772 = vst [vmem:[%s1429_s7 + $0x20] sm:$0xff] %v756_v54  ;;  %v745_v56 = vmul.f32 0.6931472, %v1090_v55 }
 0x351   :  { %v759_v57 = vsub.f32 %v1343_v39, %v735_v18 }
 0x352   :  { %v1092_v58 = vpop.eup %1091  ;;  %v764_v59 = vsub.f32 %v1339_v33, %v745_v56 }
 0x353   :  { %v1094_v31 = vpop.eup %1093  ;;  %775 = vst [vmem:[%s1429_s7 + $0x38] sm:$0xff] %v759_v57  ;;  %v751_v25 = vmul.f32 0.6931472, %v1092_v58 }
 0x354   :  { %780 = vst [vmem:[%s1429_s7 + $0x60] sm:$0xff] %v764_v59  ;;  %v733_v60 = vmul.f32 0.6931472, %v1094_v31 }
 0x355   :  { %v767_v61 = vsub.f32 %v1351_v47, %v751_v25 }
 0x356   :  { %v758_v1 = vsub.f32 %v1347_v41, %v733_v60 }
 0x357   :  { %v1096_v62 = vpop.eup %1095  ;;  %783 = vst [vmem:[%s1429_s7 + $0x78] sm:$0xff] %v767_v61 }
 0x358   :  { %v749_v33 = vmul.f32 0.6931472, %v1096_v62  ;;  %774 = vst [vmem:[%s1429_s7 + $0x30] sm:$0xff] %v758_v1 }
 0x35a   :  { %v766_v39 = vsub.f32 %v1355_v49, %v749_v33 }
 0x35c   :  { %782 = vst [vmem:[%s1429_s7 + $0x70] sm:$0xff] %v766_v39 }

</bundles_post_ra>
